<compile_context>
chip_gen: v5e
topology: v5e:2x2
jax: 0.10.0
libtpu: 0.0.40
codegen_flags: <defaults>
</compile_context>

<pallas_src>
import jax
import jax.numpy as jnp
from jax.experimental import pallas as pl
from jax.experimental.pallas import tpu as pltpu

BN_EPS = 1e-5
_LANE = 128


def _pool_fc_kernel(feats_ref, wt_ref, b_ref, out_ref):
    # feats_ref: (bt, HW, C)  wt_ref: (C, Ep) pre-scaled by 1/HW  b_ref: (1, Ep)  out_ref: (bt, Ep)
    x = feats_ref[...].astype(jnp.float32)            # upcast on load (bf16-friendly / v5e VPU)
    pooled = jnp.sum(x, axis=1)                       # (bt, C); avg-pool scale folded into wt
    out_ref[...] = (
        jnp.dot(pooled, wt_ref[...], preferred_element_type=jnp.float32) + b_ref[...]
    )


def _bn_train_kernel(y_ref, gamma_ref, beta_ref, out_ref):
    # Train-mode BatchNorm1d (biased batch statistics) on the tiny (B, Ep) embedding.
    y = y_ref[...]
    mu = jnp.mean(y, axis=0, keepdims=True)
    diff = y - mu
    var = jnp.mean(diff * diff, axis=0, keepdims=True)
    out_ref[...] = gamma_ref[...] * diff * jax.lax.rsqrt(var + BN_EPS) + beta_ref[...]


def _round_up(x, m):
    return (x + m - 1) // m * m


def encoder_cnn_forward(conv_feats_nhwc, fc_w, fc_b, bn_gamma, bn_beta):
    """conv_feats_nhwc: (B, H, W, C) trunk output (bf16 or f32), channels lane-dense.
    fc_w: (E, C) PyTorch-layout Linear weight; fc_b / bn_gamma / bn_beta: (E,).
    Returns (B, E) float32 embeddings (train-mode BatchNorm applied when B > 1)."""
    B, H, W, C = conv_feats_nhwc.shape
    E = fc_w.shape[0]
    HW = H * W

    # Contiguous reshape (no data movement): (B, H, W, C) -> (B, HW, C).
    feats = conv_feats_nhwc.reshape(B, HW, C)

    # Frozen-weight prep (tiny, once per call): transpose to (C, E), fold the 1/HW
    # adaptive-avg-pool scale into the weight, pad embed dim to a lane multiple so stores
    # are full unmasked vst. The pad is sliced off at the end.
    Ep = _round_up(E, _LANE)
    wt = (jnp.transpose(fc_w, (1, 0)) / jnp.float32(HW)).astype(jnp.float32)
    b2 = fc_b.reshape(1, E).astype(jnp.float32)
    gamma2 = bn_gamma.reshape(1, E).astype(jnp.float32)
    beta2 = bn_beta.reshape(1, E).astype(jnp.float32)
    if Ep != E:
        wt, b2, gamma2, beta2 = (
            jnp.pad(a, ((0, 0), (0, Ep - E))) for a in (wt, b2, gamma2, beta2)
        )

    # ---- Per-generation block sizing (v5e/v6e: 128 MiB VMEM, v7x: 64 MiB per TC) ----
    try:
        vmem_cap = int(pltpu.get_tpu_info().vmem_capacity_bytes)
    except Exception:
        vmem_cap = 64 << 20                            # conservative fallback (v7x per-TC)

    bytes_per_image = HW * C * feats.dtype.itemsize
    # VMEM per streamed image: 2 pipeline buffers + f32 upcast temp (when input < 4B)
    # + the pooled (C,) f32 row.
    upcast_tmp = HW * C * 4 if feats.dtype.itemsize < 4 else 0
    per_image_vmem = 2 * bytes_per_image + upcast_tmp + C * 4
    # Resident (double-buffered) frozen weight + bias, out blocks and compiler scratch margin.
    fixed_vmem = 2 * (C * Ep * 4 + Ep * 4) + (3 << 20)
    pipeline_budget = min((vmem_cap * 3) // 4, 48 << 20)
    bt_cap = max(1, int((pipeline_budget - fixed_vmem) // per_image_vmem))

    if B == 1:
        bt = 1
    else:
        # >= 2 grid steps so both v7x TensorCores get work (neutral on 1-TC v5e/v6e);
        # >= 4 steps when possible so each core still overlaps DMA with compute.
        min_steps = 2 if B < 4 else 4
        bt = max(1, min(bt_cap, pl.cdiv(B, min_steps)))  # clamped to the VMEM cap
    nb = pl.cdiv(B, bt)

    vmem_limit = int(min(max(fixed_vmem + bt * per_image_vmem + (1 << 20), 32 << 20),
                         (vmem_cap * 3) // 4))

    cost = pl.CostEstimate(
        flops=2 * B * C * Ep + B * HW * C,
        transcendentals=0,
        bytes_accessed=(B * HW * C * feats.dtype.itemsize
                        + C * Ep * 4 + Ep * 4 + nb * bt * Ep * 4),
    )

    # Kernel 1: streamed pooling + fc. Output is (nb, bt, Ep) so each out block covers the
    # full last-two dims (lane-dense, no (8,128) edge cases for any bt).
    y3 = pl.pallas_call(
        _pool_fc_kernel,
        out_shape=jax.ShapeDtypeStruct((nb, bt, Ep), jnp.float32),
        grid=(nb,),
        in_specs=[
            # feature map: streamed per batch tile (double-buffered by Pallas)
            pl.BlockSpec((bt, HW, C), lambda i: (i, 0, 0)),
            # frozen fc weight / bias: constant index_map -> fetched once, VMEM-resident
            pl.BlockSpec((C, Ep), lambda i: (0, 0)),
            pl.BlockSpec((1, Ep), lambda i: (0, 0)),
        ],
        out_specs=pl.BlockSpec((None, bt, Ep), lambda i: (i, 0, 0)),
        compiler_params=pltpu.CompilerParams(
            dimension_semantics=("parallel",),         # megacore-shard the batch grid
            vmem_limit_bytes=vmem_limit,
        ),
        cost_estimate=cost,
    )(feats, wt, b2)

    y = y3.reshape(nb * bt, Ep)
    if nb * bt != B:
        y = y[:B]                                      # drop ragged-tail rows (garbage)

    if B > 1:
        # Cheap epilogue on a few-KB tensor; keeps the HBM-bound kernel batch-decoupled.
        vmem = pltpu.MemorySpace.VMEM
        y = pl.pallas_call(
            _bn_train_kernel,
            out_shape=jax.ShapeDtypeStruct((B, Ep), jnp.float32),
            in_specs=[pl.BlockSpec(memory_space=vmem)] * 3,
            out_specs=pl.BlockSpec(memory_space=vmem),
        )(y, gamma2, beta2)

    return y[:, :E] if Ep != E else y


def _reference(conv_feats_nhwc, fc_w, fc_b, bn_gamma, bn_beta):
    B = conv_feats_nhwc.shape[0]
    pooled = jnp.mean(conv_feats_nhwc.astype(jnp.float32), axis=(1, 2))   # (B, C)
    y = jnp.dot(pooled, fc_w.T, precision=jax.lax.Precision.HIGHEST) + fc_b
    if B > 1:
        mu = jnp.mean(y, axis=0, keepdims=True)
        var = jnp.mean((y - mu) ** 2, axis=0, keepdims=True)
        y = bn_gamma * (y - mu) * jax.lax.rsqrt(var + BN_EPS) + bn_beta
    return y


if __name__ == "__main__":
    key = jax.random.PRNGKey(0)
    # ResNet-152 final conv map for 224x224 images: 7x7x2048 (NHWC). Small-batch demo.
    B, H, W, C = 8, 7, 7, 2048
    embed_size = 32

    k1, k2, k3 = jax.random.split(key, 3)
    # Trunk output fed in bf16: halves HBM traffic of the dominant feature-map read.
    conv_feats = jax.random.normal(k1, (B, H, W, C), dtype=jnp.float32).astype(jnp.bfloat16)

    # nn.Linear(2048, embed_size) default init: U(-1/sqrt(C), 1/sqrt(C))
    bound = 1.0 / jnp.sqrt(jnp.float32(C))
    fc_w = jax.random.uniform(k2, (embed_size, C), jnp.float32, -bound, bound)
    fc_b = jax.random.uniform(k3, (embed_size,), jnp.float32, -bound, bound)
    # nn.BatchNorm1d default init: weight=1, bias=0
    bn_gamma = jnp.ones((embed_size,), jnp.float32)
    bn_beta = jnp.zeros((embed_size,), jnp.float32)

    out = encoder_cnn_forward(conv_feats, fc_w, fc_b, bn_gamma, bn_beta)
    out = jax.block_until_ready(out)

    ref = _reference(conv_feats, fc_w, fc_b, bn_gamma, bn_beta)
    assert out.shape == (B, embed_size)
    # bf16 feature map + MXU accumulation-order differences, amplified by BN's divide by
    # small per-column batch stds -> compare with a modest tolerance.
    assert jnp.allclose(out, ref, atol=2e-2, rtol=2e-2), "mismatch vs reference"
    print("KERNEL_OK")
</pallas_src>

<mosaic_0001>
module attributes {stable_mosaic.version = 11 : i64} {
  func.func @_pool_fc_kernel(%arg0: i32, %arg1: memref<2x49x2048xbf16, #tpu.memory_space<vmem>>, %arg2: memref<2048x128xf32, #tpu.memory_space<vmem>>, %arg3: memref<1x128xf32, #tpu.memory_space<vmem>>, %arg4: memref<1x2x128xf32, #tpu.memory_space<vmem>>) attributes {dimension_semantics = [#tpu.dimension_semantics<parallel>], iteration_bounds = array<i64: 4>, scalar_prefetch = 0 : i64, scratch_operands = 0 : i64, tpu.core_type = #tpu.core_type<tc>, window_params = [{transform_indices = @transform_0, window_bounds = array<i64: 2, 49, 2048>}, {pipeline_mode = #tpu.pipeline_mode<synchronous>, transform_indices = @transform_1, window_bounds = array<i64: 2048, 128>}, {pipeline_mode = #tpu.pipeline_mode<synchronous>, transform_indices = @transform_2, window_bounds = array<i64: 1, 128>}, {transform_indices = @transform_3, window_bounds = array<i64: 1, 2, 128>}]} {
    %c0 = arith.constant 0 : index
    %c0_0 = arith.constant 0 : index
    %c0_1 = arith.constant 0 : index
    %0 = vector.load %arg1[%c0, %c0_0, %c0_1] : memref<2x49x2048xbf16, #tpu.memory_space<vmem>>, vector<2x49x2048xbf16>
    %1 = arith.extf %0 : vector<2x49x2048xbf16> to vector<2x49x2048xf32>
    %cst = arith.constant dense<0.000000e+00> : vector<2x2048xf32>
    %2 = vector.multi_reduction <add>, %1, %cst [1] : vector<2x49x2048xf32> to vector<2x2048xf32>
    %c0_2 = arith.constant 0 : index
    %c0_3 = arith.constant 0 : index
    %3 = vector.load %arg2[%c0_2, %c0_3] : memref<2048x128xf32, #tpu.memory_space<vmem>>, vector<2048x128xf32>
    %cst_4 = arith.constant dense<0.000000e+00> : vector<2x128xf32>
    %4 = tpu.matmul %2, %3, %cst_4 {dimension_numbers = #tpu.dot_dimension_numbers<[1], [0], [0], [1], [0, 0, 1, 1], [], []>} : vector<2x2048xf32>, vector<2048x128xf32>, vector<2x128xf32> -> vector<2x128xf32>
    %c0_5 = arith.constant 0 : index
    %c0_6 = arith.constant 0 : index
    %5 = vector.load %arg3[%c0_5, %c0_6] : memref<1x128xf32, #tpu.memory_space<vmem>>, vector<1x128xf32>
    %6 = vector.broadcast %5 : vector<1x128xf32> to vector<2x128xf32>
    %7 = arith.addf %4, %6 : vector<2x128xf32>
    %c0_7 = arith.constant 0 : index
    %c0_8 = arith.constant 0 : index
    %c0_9 = arith.constant 0 : index
    %8 = vector.load %arg4[%c0_7, %c0_8, %c0_9] : memref<1x2x128xf32, #tpu.memory_space<vmem>>, vector<1x2x128xf32>
    %9 = vector.shape_cast %8 : vector<1x2x128xf32> to vector<2x128xf32>
    %10 = vector.shape_cast %7 : vector<2x128xf32> to vector<1x2x128xf32>
    tpu.vector_store %arg4[%c0_7, %c0_8, %c0_9], %10 {strides = array<i32>} : memref<1x2x128xf32, #tpu.memory_space<vmem>>, vector<1x2x128xf32>,
    return
  }
  func.func @transform_0(%arg0: i32) -> (i32, i32, i32) {
    %c0_i32 = arith.constant 0 : i32
    %c0_i32_0 = arith.constant 0 : i32
    %c0_i32_1 = arith.constant 0 : i32
    return %arg0, %c0_i32, %c0_i32_0 : i32, i32, i32
  }
  func.func @transform_1(%arg0: i32) -> (i32, i32) {
    %c0_i32 = arith.constant 0 : i32
    %c0_i32_0 = arith.constant 0 : i32
    %c0_i32_1 = arith.constant 0 : i32
    return %c0_i32, %c0_i32_0 : i32, i32
  }
  func.func @transform_2(%arg0: i32) -> (i32, i32) {
    %c0_i32 = arith.constant 0 : i32
    %c0_i32_0 = arith.constant 0 : i32
    %c0_i32_1 = arith.constant 0 : i32
    return %c0_i32, %c0_i32_0 : i32, i32
  }
  func.func @transform_3(%arg0: i32) -> (i32, i32, i32) {
    %c0_i32 = arith.constant 0 : i32
    %c0_i32_0 = arith.constant 0 : i32
    %c0_i32_1 = arith.constant 0 : i32
    return %arg0, %c0_i32, %c0_i32_0 : i32, i32, i32
  }
}

</mosaic_0001>

<bundles_post_ra>
// kernel: tpu_custom_call.1
= control target key start
LH: loop header
LB: loop body
LE: loop exit
PB: predicated region body
PF: predicated region fallthrough
CT: control target
= control target key end

     0   :  { %8 = vsyncpa [#allocation3], 0  ;;  %s3266_s0 = inlined_call_operand.vmem [shape: bf16[8,49,2048], index: 0, kind: input, shape index: {}]   ;;  %s3267_s1 = inlined_call_operand.vmem [shape: f32[2048,128], index: 1, kind: input, shape index: {}]   ;;  %s3268_s2 = inlined_call_operand.vmem [shape: f32[1,128], index: 2, kind: input, shape index: {}]   ;;  %s3269_s3 = inlined_call_operand.hbm [shape: f32[4,2,128], index: 3, kind: output, shape index: {}]  }
   0x1   :  { %10 = vsyncpa [#allocation3 + $0x1], 0  ;;  %s1784_s12 = smov 0   ;;  %s1786_s13 = smov 0  }
   0x2   :  { %s1788_s14 = smov 0   ;;  %s1790_s15 = smov 0  }
   0x3 LB: > { %s1647_s16 = sadd.s32 4294967295, %s1762_s15   ;;  %s1648_s17 = sadd.s32 4294967294, %s1762_s15   ;;  %s1762_s15 = sphi %s1790_s15, %s3275_s15   ;;  %s1758_s14 = sphi %s1788_s14, %s3274_s14   ;;  %s1754_s13 = sphi %s1786_s13, %s3273_s13   ;;  %s1750_s12 = sphi %s1784_s12, %s3272_s12  }
   0x4   : > { %s1807_s18 = sadd.s32 1, %s1762_s15   ;;  %s91_s19 = sadd.s32 1, %s1758_s14 }
   0x5   : > { %s88_s20 = ssub.s32 %s1762_s15, %s1807_s18  ;;  %p101_p0 = scmp.ne.s32.totalorder %s1758_s14, %s1754_s13 }
   0x6   : > { %p89_p1 = scmp.eq.s32.totalorder %s88_s20, 0  ;;  %p102_p2 = scmp.eq.s32.totalorder %s1647_s16, 3 }
   0x7   : > { %p107_p3 = scmp.ne.s32.totalorder %s1754_s13, %s1750_s12  ;;  %p108_p4 = scmp.eq.s32.totalorder %s1648_s17, 3 }
   0x8   : > { %s1819_s21 = scalar_select %p89_p1, %s1758_s14, %s91_s19  }
   0x9   : > { %p1821_p5 = por %p102_p2, %p101_p0  ;;  %p1825_p6 = por %p108_p4, %p107_p3 }
   0xa   : > { %p1651_p7 = scmp.ge.s32.totalorder %s1762_s15, 1  ;;  %p142_p8 = scmp.lt.s32.totalorder %s1762_s15, 5 }
   0xc   : > { %p143_p9 = pnand %p1651_p7, %p142_p8 }
   0xd   : > { %s1995_s24 = sshll.u32 (!%p143_p9), %s1647_s16, 1  ;;  %s164_s25 = sand.u32 (!%p143_p9), 1, %s1754_s13  }
   0xe   : > { %146 = sbr.rel (%p143_p9) target bundleno = 379 (0x17b), region = 32  ;;  %p168_p10 = scmp.lt.s32.totalorder (!%p143_p9), %s1995_s24, 7 }
   0xf   : > { %s1584_s28 = scalar_lea.hbm (!%p143_p9), %s3269_s3, %s1995_s24  ;;  %s1574_s4 = scalar_lea.sflag (!%p143_p9), [#allocation3], %s164_s25 }
  0x10   : > { %s1588_s30 = sshll.u32 (!%p143_p9), %s1584_s28, 4  ;;  %s1589_s30 = int_to_ptr.hbm [resolvable:$true] %s1588_s30 }
  0x11   : > { %s1714_s16 = sshra.s32 (!%p143_p9), %s1589_s30, 4  ;;  %s1715_s16 = int_to_ptr.hbm [resolvable:$true] %s1714_s16 }
  0x12   : > { %s1716_s5 = scalar_lea.hbm (!%p143_p9), %s1715_s16, 2  ;;  %p1721_p0 = scmp.lt.s32.totalorder (!%p143_p9), %s1715_s16, %s3269_s3 }
  0x13   : > { %v942_v0 = vld [vmem:[%s3267_s1 + $0x78] sm:$0xff]  ;;  %v941_v2 = vld [vmem:[%s3267_s1 + $0x70] sm:$0xff]  ;;  %v940_v6 = vld [vmem:[%s3267_s1 + $0x68] sm:$0xff]  ;;  %s2043_s7 = scalar_select %p168_p10, %s1995_s24, 7  ;;  %vm515_vm0 = vcmask 1040384   ;;  %vm1219_vm1 = vcmask 1041409  }
  0x14   : > { %v974_v1 = vld [vmem:[%s3267_s1 + $0x178] sm:$0xff]  ;;  %1252 = vmatpush.msra.mxu0 %v942_v0  ;;  %v973_v4 = vld [vmem:[%s3267_s1 + $0x170] sm:$0xff]  ;;  %v972_v8 = vld [vmem:[%s3267_s1 + $0x168] sm:$0xff]  ;;  %p1717_p11 = scmp.ne.s32.totalorder %s1715_s16, %s1716_s5  ;;  %s1720_s24 = scalar_lea.hbm %s3269_s3, 8 }
  0x15   : > { %1292 = vmatpush.msra.mxu2 %v974_v1  ;;  %v958_v3 = vld [vmem:[%s3267_s1 + $0xf8] sm:$0xff]  ;;  %v957_v7 = vld [vmem:[%s3267_s1 + $0xf0] sm:$0xff]  ;;  %v956_v10 = vld [vmem:[%s3267_s1 + $0xe8] sm:$0xff]  ;;  %s1659_s6 = smul.u32 448, %s2043_s7  ;;  %s1652_s7 = sshll.u32 %s164_s25, 1 }
  0x16   : > { %v990_v5 = vld [vmem:[%s3267_s1 + $0x1f8] sm:$0xff]  ;;  %1272 = vmatpush.msra.mxu1 %v958_v3  ;;  %1253 = vmatpush.msra.mxu0 %v941_v2  ;;  %v989_v9 = vld [vmem:[%s3267_s1 + $0x1f0] sm:$0xff]  ;;  %v939_v11 = vld [vmem:[%s3267_s1 + $0x60] sm:$0xff]  ;;  %p1718_p12 = pnand %p1717_p11, %p1821_p5  ;;  %p1722_p1 = scmp.lt.s32.totalorder %s1720_s24, %s1716_s5 }
  0x17   : > { %1312 = vmatpush.msra.mxu3 %v990_v5  ;;  %1293 = vmatpush.msra.mxu2 %v973_v4  ;;  %v971_v12 = vld [vmem:[%s3267_s1 + $0x160] sm:$0xff]  ;;  %v988_v13 = vld [vmem:[%s3267_s1 + $0x1e8] sm:$0xff]  ;;  %v938_v16 = vld [vmem:[%s3267_s1 + $0x58] sm:$0xff]  ;;  %s2103_s19 = scalar_lea.vmem %s3266_s0, %s1659_s6  ;;  %s166_s6 = scalar_lea.vmem [#allocation2], %s1652_s7 }
  0x18   : > { %1273 = vmatpush.msra.mxu1 %v957_v7  ;;  %1254 = vmatpush.msra.mxu0 %v940_v6  ;;  %v955_v14 = vld [vmem:[%s3267_s1 + $0xe0] sm:$0xff]  ;;  %v970_v17 = vld [vmem:[%s3267_s1 + $0x158] sm:$0xff]  ;;  %v937_v20 = vld [vmem:[%s3267_s1 + $0x50] sm:$0xff]  ;;  %s1586_s29 = sshll.u32 %s166_s6, 4  ;;  %p1719_p13 = pneg %p1718_p12  ;;  %s1587_s29 = int_to_ptr.vmem [resolvable:$true] %s1586_s29 }
  0x19   : > { %1313 = vmatpush.msra.mxu3 %v989_v9  ;;  %1294 = vmatpush.msra.mxu2 %v972_v8  ;;  %v987_v15 = vld [vmem:[%s3267_s1 + $0x1e0] sm:$0xff]  ;;  %v954_v18 = vld [vmem:[%s3267_s1 + $0xd8] sm:$0xff]  ;;  %v969_v21 = vld [vmem:[%s3267_s1 + $0x150] sm:$0xff]  ;;  %p1723_p2 = por %p1722_p1, %p1721_p0 }
  0x1a   : > { %1274 = vmatpush.msra.mxu1 %v956_v10  ;;  %1255 = vmatpush.msra.mxu0 %v939_v11  ;;  %v986_v19 = vld [vmem:[%s3267_s1 + $0x1d8] sm:$0xff]  ;;  %v953_v22 = vld [vmem:[%s3267_s1 + $0xd0] sm:$0xff]  ;;  %v936_v24 = vld [vmem:[%s3267_s1 + $0x48] sm:$0xff] }
  0x1b   : > { %1314 = vmatpush.msra.mxu3 %v988_v13  ;;  %1295 = vmatpush.msra.mxu2 %v971_v12  ;;  %v985_v23 = vld [vmem:[%s3267_s1 + $0x1d0] sm:$0xff]  ;;  %v968_v25 = vld [vmem:[%s3267_s1 + $0x148] sm:$0xff]  ;;  %v935_v28 = vld [vmem:[%s3267_s1 + $0x40] sm:$0xff]  ;;  %p1724_p3 = pnand %p1723_p2, %p1719_p13 }
  0x1c   : > { %1275 = vmatpush.msra.mxu1 %v955_v14  ;;  %1256 = vmatpush.msra.mxu0 %v938_v16  ;;  %v952_v26 = vld [vmem:[%s3267_s1 + $0xc8] sm:$0xff]  ;;  %v967_v29 = vld [vmem:[%s3267_s1 + $0x140] sm:$0xff]  ;;  %v934_v32 = vld [vmem:[%s3267_s1 + $0x38] sm:$0xff] }
  0x1d   : > { %1315 = vmatpush.msra.mxu3 %v987_v15  ;;  %1296 = vmatpush.msra.mxu2 %v970_v17  ;;  %v984_v27 = vld [vmem:[%s3267_s1 + $0x1c8] sm:$0xff]  ;;  %v951_v30 = vld [vmem:[%s3267_s1 + $0xc0] sm:$0xff]  ;;  %v966_v33 = vld [vmem:[%s3267_s1 + $0x138] sm:$0xff] }
  0x1e   : > { %1276 = vmatpush.msra.mxu1 %v954_v18  ;;  %1257 = vmatpush.msra.mxu0 %v937_v20  ;;  %v983_v31 = vld [vmem:[%s3267_s1 + $0x1c0] sm:$0xff]  ;;  %v950_v34 = vld [vmem:[%s3267_s1 + $0xb8] sm:$0xff]  ;;  %v933_v36 = vld [vmem:[%s3267_s1 + $0x30] sm:$0xff] }
  0x1f   : > { %1316 = vmatpush.msra.mxu3 %v986_v19  ;;  %1297 = vmatpush.msra.mxu2 %v969_v21  ;;  %v982_v35 = vld [vmem:[%s3267_s1 + $0x1b8] sm:$0xff]  ;;  %v965_v37 = vld [vmem:[%s3267_s1 + $0x130] sm:$0xff]  ;;  %v932_v40 = vld [vmem:[%s3267_s1 + $0x28] sm:$0xff] }
  0x20   : > { %1277 = vmatpush.msra.mxu1 %v953_v22  ;;  %1258 = vmatpush.msra.mxu0 %v936_v24  ;;  %v949_v38 = vld [vmem:[%s3267_s1 + $0xb0] sm:$0xff]  ;;  %v964_v41 = vld [vmem:[%s3267_s1 + $0x128] sm:$0xff]  ;;  %v931_v44 = vld [vmem:[%s3267_s1 + $0x20] sm:$0xff] }
  0x21   : > { %1317 = vmatpush.msra.mxu3 %v985_v23  ;;  %1298 = vmatpush.msra.mxu2 %v968_v25  ;;  %v981_v39 = vld [vmem:[%s3267_s1 + $0x1b0] sm:$0xff]  ;;  %v948_v42 = vld [vmem:[%s3267_s1 + $0xa8] sm:$0xff]  ;;  %v963_v45 = vld [vmem:[%s3267_s1 + $0x120] sm:$0xff] }
  0x22   : > { %1278 = vmatpush.msra.mxu1 %v952_v26  ;;  %1259 = vmatpush.msra.mxu0 %v935_v28  ;;  %v980_v43 = vld [vmem:[%s3267_s1 + $0x1a8] sm:$0xff]  ;;  %v947_v46 = vld [vmem:[%s3267_s1 + $0xa0] sm:$0xff]  ;;  %v930_v48 = vld [vmem:[%s3267_s1 + $0x18] sm:$0xff] }
  0x23   : > { %1318 = vmatpush.msra.mxu3 %v984_v27  ;;  %1299 = vmatpush.msra.mxu2 %v967_v29  ;;  %v979_v47 = vld [vmem:[%s3267_s1 + $0x1a0] sm:$0xff]  ;;  %v962_v49 = vld [vmem:[%s3267_s1 + $0x118] sm:$0xff]  ;;  %v929_v52 = vld [vmem:[%s3267_s1 + $0x10] sm:$0xff] }
  0x24   : > { %1279 = vmatpush.msra.mxu1 %v951_v30  ;;  %1260 = vmatpush.msra.mxu0 %v934_v32  ;;  %v946_v50 = vld [vmem:[%s3267_s1 + $0x98] sm:$0xff]  ;;  %v961_v53 = vld [vmem:[%s3267_s1 + $0x110] sm:$0xff]  ;;  %v928_v56 = vld [vmem:[%s3267_s1 + $0x8] sm:$0xff] }
  0x25   : > { %1319 = vmatpush.msra.mxu3 %v983_v31  ;;  %1300 = vmatpush.msra.mxu2 %v966_v33  ;;  %v978_v51 = vld [vmem:[%s3267_s1 + $0x198] sm:$0xff]  ;;  %v945_v54 = vld [vmem:[%s3267_s1 + $0x90] sm:$0xff]  ;;  %v960_v57 = vld [vmem:[%s3267_s1 + $0x108] sm:$0xff] }
  0x26   : > { %1280 = vmatpush.msra.mxu1 %v950_v34  ;;  %1261 = vmatpush.msra.mxu0 %v933_v36  ;;  %v977_v55 = vld [vmem:[%s3267_s1 + $0x190] sm:$0xff]  ;;  %v944_v58 = vld [vmem:[%s3267_s1 + $0x88] sm:$0xff]  ;;  %v927_v60 = vld [vmem:[%s3267_s1] sm:$0xff] }
  0x27   : > { %1320 = vmatpush.msra.mxu3 %v982_v35  ;;  %1301 = vmatpush.msra.mxu2 %v965_v37  ;;  %v976_v59 = vld [vmem:[%s3267_s1 + $0x188] sm:$0xff]  ;;  %v959_v61 = vld [vmem:[%s3267_s1 + $0x100] sm:$0xff]  ;;  %v1006_v62 = vld [vmem:[%s3267_s1 + $0x278] sm:$0xff] }
  0x28   : > { %1281 = vmatpush.msra.mxu1 %v949_v38  ;;  %1262 = vmatpush.msra.mxu0 %v932_v40  ;;  %v1038_v63 = vld [vmem:[%s3267_s1 + $0x378] sm:$0xff]  ;;  %v943_v0 = vld [vmem:[%s3267_s1 + $0x80] sm:$0xff]  ;;  %v1005_v2 = vld [vmem:[%s3267_s1 + $0x270] sm:$0xff] }
  0x29   : > { %1321 = vmatpush.msra.mxu3 %v981_v39  ;;  %1302 = vmatpush.msra.mxu2 %v964_v41  ;;  %v975_v1 = vld [vmem:[%s3267_s1 + $0x180] sm:$0xff]  ;;  %v1022_v3 = vld [vmem:[%s3267_s1 + $0x2f8] sm:$0xff]  ;;  %v1037_v4 = vld [vmem:[%s3267_s1 + $0x370] sm:$0xff] }
  0x2a   : > { %1282 = vmatpush.msra.mxu1 %v948_v42  ;;  %1263 = vmatpush.msra.mxu0 %v931_v44  ;;  %v1054_v5 = vld [vmem:[%s3267_s1 + $0x3f8] sm:$0xff]  ;;  %v1004_v6 = vld [vmem:[%s3267_s1 + $0x268] sm:$0xff]  ;;  %v1021_v7 = vld [vmem:[%s3267_s1 + $0x2f0] sm:$0xff] }
  0x2b   : > { %1322 = vmatpush.msra.mxu3 %v980_v43  ;;  %1303 = vmatpush.msra.mxu2 %v963_v45  ;;  %v1036_v8 = vld [vmem:[%s3267_s1 + $0x368] sm:$0xff]  ;;  %v1053_v9 = vld [vmem:[%s3267_s1 + $0x3f0] sm:$0xff]  ;;  %v1003_v10 = vld [vmem:[%s3267_s1 + $0x260] sm:$0xff] }
  0x2c   : > { %1283 = vmatpush.msra.mxu1 %v947_v46  ;;  %1264 = vmatpush.msra.mxu0 %v930_v48  ;;  %v1020_v11 = vld [vmem:[%s3267_s1 + $0x2e8] sm:$0xff]  ;;  %v1035_v12 = vld [vmem:[%s3267_s1 + $0x360] sm:$0xff]  ;;  %v1002_v14 = vld [vmem:[%s3267_s1 + $0x258] sm:$0xff] }
  0x2d   : > { %1323 = vmatpush.msra.mxu3 %v979_v47  ;;  %1304 = vmatpush.msra.mxu2 %v962_v49  ;;  %v1052_v13 = vld [vmem:[%s3267_s1 + $0x3e8] sm:$0xff]  ;;  %v1019_v15 = vld [vmem:[%s3267_s1 + $0x2e0] sm:$0xff]  ;;  %v1034_v16 = vld [vmem:[%s3267_s1 + $0x358] sm:$0xff] }
  0x2e   : > { %1284 = vmatpush.msra.mxu1 %v946_v50  ;;  %1265 = vmatpush.msra.mxu0 %v929_v52  ;;  %v1051_v17 = vld [vmem:[%s3267_s1 + $0x3e0] sm:$0xff]  ;;  %v1001_v18 = vld [vmem:[%s3267_s1 + $0x250] sm:$0xff]  ;;  %v1018_v19 = vld [vmem:[%s3267_s1 + $0x2d8] sm:$0xff] }
  0x2f   : > { %1324 = vmatpush.msra.mxu3 %v978_v51  ;;  %1305 = vmatpush.msra.mxu2 %v961_v53  ;;  %v1033_v20 = vld [vmem:[%s3267_s1 + $0x350] sm:$0xff]  ;;  %v1050_v21 = vld [vmem:[%s3267_s1 + $0x3d8] sm:$0xff]  ;;  %v1000_v22 = vld [vmem:[%s3267_s1 + $0x248] sm:$0xff] }
  0x30   : > { %1285 = vmatpush.msra.mxu1 %v945_v54  ;;  %1266 = vmatpush.msra.mxu0 %v928_v56  ;;  %v1017_v23 = vld [vmem:[%s3267_s1 + $0x2d0] sm:$0xff]  ;;  %v1032_v24 = vld [vmem:[%s3267_s1 + $0x348] sm:$0xff]  ;;  %v999_v26 = vld [vmem:[%s3267_s1 + $0x240] sm:$0xff] }
  0x31   : > { %1325 = vmatpush.msra.mxu3 %v977_v55  ;;  %1306 = vmatpush.msra.mxu2 %v960_v57  ;;  %v1049_v25 = vld [vmem:[%s3267_s1 + $0x3d0] sm:$0xff]  ;;  %v1016_v27 = vld [vmem:[%s3267_s1 + $0x2c8] sm:$0xff]  ;;  %v1031_v28 = vld [vmem:[%s3267_s1 + $0x340] sm:$0xff] }
  0x32   : > { %1286 = vmatpush.msra.mxu1 %v944_v58  ;;  %1267 = vmatpush.msra.mxu0 %v927_v60  ;;  %v1048_v29 = vld [vmem:[%s3267_s1 + $0x3c8] sm:$0xff]  ;;  %v2130_v30 = vld [vmem:[%s2103_s19] sm:$0xff]  ;;  %v998_v33 = vld [vmem:[%s3267_s1 + $0x238] sm:$0xff] }
  0x33   : > { %1326 = vmatpush.msra.mxu3 %v976_v59  ;;  %1307 = vmatpush.msra.mxu2 %v959_v61  ;;  %v2133_v31 = vld [vmem:[%s2103_s19 + $0x40] sm:$0xff]  ;;  %v286_v38 = vunpack.c.l.bf16 %v2130_v30  ;;  %v1030_v41 = vld [vmem:[%s3267_s1 + $0x338] sm:$0xff]  ;;  %v997_v46 = vld [vmem:[%s3267_s1 + $0x230] sm:$0xff] }
  0x34   : > { %1332 = vmatpush.msrb.mxu0 %v1006_v62  ;;  %1287 = vmatpush.msra.mxu1 %v943_v0  ;;  %v2136_v32 = vld [vmem:[%s2103_s19 + $0x80] sm:$0xff]  ;;  %v302_v39 = vunpack.c.l.bf16 %v2133_v31  ;;  %v1014_v47 = vld [vmem:[%s3267_s1 + $0x2b8] sm:$0xff]  ;;  %v1029_v55 = vld [vmem:[%s3267_s1 + $0x330] sm:$0xff] }
  0x35   : > { %1372 = vmatpush.msrb.mxu2 %v1038_v63  ;;  %1327 = vmatpush.msra.mxu3 %v975_v1  ;;  %v1015_v34 = vld [vmem:[%s3267_s1 + $0x2c0] sm:$0xff]  ;;  %v318_v40 = vunpack.c.l.bf16 %v2136_v32  ;;  %v1046_v56 = vld [vmem:[%s3267_s1 + $0x3b8] sm:$0xff]  ;;  %v2205_v62 = vld [vmem:[%s2103_s19 + $0x8] sm:$0xff]  ;;  %v287_v63 = vunpack.c.h.bf16 %v2130_v30 }
  0x36   : > { %1333 = vmatpush.msrb.mxu0 %v1005_v2  ;;  %1352 = vmatpush.msrb.mxu1 %v1022_v3  ;;  %v2145_v35 = vld [vmem:[%s2103_s19 + $0xc0] sm:$0xff]  ;;  %v510_v54 = vadd.f32 %v302_v39, %v286_v38  ;;  %v996_v0 = vld [vmem:[%s3267_s1 + $0x228] sm:$0xff]  ;;  %v1013_v1 = vld [vmem:[%s3267_s1 + $0x2b0] sm:$0xff] }
  0x37   : > { %1373 = vmatpush.msrb.mxu2 %v1037_v4  ;;  %1392 = vmatpush.msrb.mxu3 %v1054_v5  ;;  %v2148_v36 = vld [vmem:[%s2103_s19 + $0x100] sm:$0xff]  ;;  %v334_v51 = vunpack.c.l.bf16 %v2145_v35  ;;  %v2217_v5 = vld [vmem:[%s2103_s19 + $0x48] sm:$0xff] }
  0x38   : > { %1334 = vmatpush.msrb.mxu0 %v1004_v6  ;;  %1353 = vmatpush.msrb.mxu1 %v1021_v7  ;;  %v2151_v37 = vld [vmem:[%s2103_s19 + $0x140] sm:$0xff]  ;;  %v350_v59 = vunpack.c.l.bf16 %v2148_v36  ;;  %v511_v4 = vadd.f32 %v510_v54, %v318_v40  ;;  %v2220_v6 = vld [vmem:[%s2103_s19 + $0x88] sm:$0xff]  ;;  %v303_v7 = vunpack.c.h.bf16 %v2133_v31 }
  0x39   : > { %1374 = vmatpush.msrb.mxu2 %v1036_v8  ;;  %1393 = vmatpush.msrb.mxu3 %v1053_v9  ;;  %v1047_v42 = vld [vmem:[%s3267_s1 + $0x3c0] sm:$0xff]  ;;  %v366_v2 = vunpack.c.l.bf16 %v2151_v37  ;;  %v1028_v8 = vld [vmem:[%s3267_s1 + $0x328] sm:$0xff]  ;;  %v1045_v9 = vld [vmem:[%s3267_s1 + $0x3b0] sm:$0xff] }
  0x3a   : > { %1335 = vmatpush.msrb.mxu0 %v1003_v10  ;;  %1354 = vmatpush.msrb.mxu1 %v1020_v11  ;;  %v2163_v43 = vld [vmem:[%s2103_s19 + $0x180] sm:$0x11]  ;;  %v2267_v39 = vld [vmem:[%s2103_s19 + $0x148] sm:$0xff] }
  0x3b   : > { %1375 = vmatpush.msrb.mxu2 %v1035_v12  ;;  %1394 = vmatpush.msrb.mxu3 %v1052_v13  ;;  %v2166_v44 = vld [vmem:[%s2103_s19 + $0x1c0] sm:$0xff]  ;;  %v382_v60 = vunpack.c.l.bf16 %v2163_v43  ;;  %v2232_v13 = vld [vmem:[%s2103_s19 + $0xc8] sm:$0xff] }
  0x3c   : > { %1336 = vmatpush.msrb.mxu0 %v1002_v14  ;;  %1355 = vmatpush.msrb.mxu1 %v1019_v15  ;;  %v2169_v45 = vld [vmem:[%s2103_s19 + $0x200] sm:$0xff]  ;;  %v398_v52 = vunpack.c.l.bf16 %v2166_v44  ;;  %v2235_v14 = vld [vmem:[%s2103_s19 + $0x188] sm:$0x11]  ;;  %v319_v15 = vunpack.c.h.bf16 %v2136_v32  ;;  %v336_v54 = vunpack.c.l.bf16 %v2232_v13 }
  0x3d   : > { %1376 = vmatpush.msrb.mxu2 %v1034_v16  ;;  %1395 = vmatpush.msrb.mxu3 %v1051_v17  ;;  %v2178_v48 = vld [vmem:[%s2103_s19 + $0x240] sm:$0xff]  ;;  %v414_v53 = vunpack.c.l.bf16 %v2169_v45  ;;  %v2270_v40 = vld [vmem:[%s2103_s19 + $0x2c8] sm:$0xff] }
  0x3e   : > { %1337 = vmatpush.msrb.mxu0 %v1001_v18  ;;  %1356 = vmatpush.msrb.mxu1 %v1018_v19  ;;  %v2181_v49 = vld [vmem:[%s2103_s19 + $0x280] sm:$0xff]  ;;  %v430_v61 = vunpack.c.l.bf16 %v2178_v48  ;;  %v512_v18 = vadd.f32 %v511_v4, %v334_v51  ;;  %v2243_v19 = vld [vmem:[%s2103_s19 + $0x1c8] sm:$0xff]  ;;  %v1026_v4 = vld [vmem:[%s3267_s1 + $0x318] sm:$0xff] }
  0x3f   : > { %1377 = vmatpush.msrb.mxu2 %v1033_v20  ;;  %1396 = vmatpush.msrb.mxu3 %v1050_v21  ;;  %v2184_v50 = vld [vmem:[%s2103_s19 + $0x2c0] sm:$0xff]  ;;  %v446_v10 = vunpack.c.l.bf16 %v2181_v49  ;;  %v719_v12 = vadd.f32 %v414_v53, %v398_v52  ;;  %v2246_v20 = vld [vmem:[%s2103_s19 + $0x208] sm:$0xff] }
  0x40   : > { %1338 = vmatpush.msrb.mxu0 %v1000_v22  ;;  %1357 = vmatpush.msrb.mxu1 %v1017_v23  ;;  %v2196_v57 = vld [vmem:[%s2103_s19 + $0x300] sm:$0xff]  ;;  %v462_v11 = vunpack.c.l.bf16 %v2184_v50  ;;  %v2249_v21 = vld [vmem:[%s2103_s19 + $0x248] sm:$0xff]  ;;  %v288_v22 = vunpack.c.l.bf16 %v2205_v62  ;;  %v304_v23 = vunpack.c.l.bf16 %v2217_v5 }
  0x41   : > { %1378 = vmatpush.msrb.mxu2 %v1032_v24  ;;  %1397 = vmatpush.msrb.mxu3 %v1049_v25  ;;  %v2199_v58 = vld [vmem:[%s2103_s19 + $0x340] sm:$0x11]  ;;  %v478_v17 = vunpack.c.l.bf16 %v2196_v57  ;;  %v1012_v24 = vld [vmem:[%s3267_s1 + $0x2a8] sm:$0xff]  ;;  %v516_v25 = vsel %vm515_vm0, %v382_v60, 0.0 }
  0x42   : > { %1339 = vmatpush.msrb.mxu0 %v999_v26  ;;  %1358 = vmatpush.msrb.mxu1 %v1016_v27  ;;  %v494_v3 = vunpack.c.l.bf16 %v2199_v58  ;;  %v995_v16 = vld [vmem:[%s3267_s1 + $0x220] sm:$0xff]  ;;  %v720_v26 = vadd.f32 %v719_v12, %v430_v61  ;;  %v2258_v27 = vld [vmem:[%s2103_s19 + $0x108] sm:$0xff]  ;;  %v368_v12 = vunpack.c.l.bf16 %v2267_v39  ;;  %v495_v31 = vunpack.c.h.bf16 %v2199_v58 }
  0x43   : > { %1379 = vmatpush.msrb.mxu2 %v1031_v28  ;;  %1398 = vmatpush.msrb.mxu3 %v1048_v29  ;;  %v2261_v28 = vld [vmem:[%s2103_s19 + $0x288] sm:$0xff]  ;;  %v320_v29 = vunpack.c.l.bf16 %v2220_v6  ;;  %v1011_v60 = vld [vmem:[%s3267_s1 + $0x2a0] sm:$0xff] }
  0x44   : > { %1340 = vmatpush.msrb.mxu0 %v998_v33  ;;  %1359 = vmatpush.msrb.mxu1 %v1015_v34  ;;  %v400_v33 = vunpack.c.l.bf16 %v2243_v19  ;;  %v513_v34 = vadd.f32 %v512_v18, %v350_v59  ;;  %v724_v38 = vsel %vm515_vm0, %v494_v3, 0.0  ;;  %v1044_v51 = vld [vmem:[%s3267_s1 + $0x3a8] sm:$0xff]  ;;  %v721_v52 = vadd.f32 %v720_v26, %v446_v10  ;;  %v994_v59 = vld [vmem:[%s3267_s1 + $0x218] sm:$0xff]  ;;  %v1025_v26 = vld [vmem:[%s3267_s1 + $0x310] sm:$0xff] }
  0x45   : > { %1380 = vmatpush.msrb.mxu2 %v1030_v41  ;;  %1399 = vmatpush.msrb.mxu3 %v1047_v42  ;;  %v2273_v41 = vld [vmem:[%s2103_s19 + $0x348] sm:$0x11]  ;;  %v416_v42 = vunpack.c.l.bf16 %v2246_v20  ;;  %v352_v10 = vunpack.c.l.bf16 %v2258_v27  ;;  %v1010_v18 = vld [vmem:[%s3267_s1 + $0x298] sm:$0xff]  ;;  %v1039_v30 = vld [vmem:[%s3267_s1 + $0x380] sm:$0xff] }
  0x46   : > { %1341 = vmatpush.msrb.mxu0 %v997_v46  ;;  %1360 = vmatpush.msrb.mxu1 %v1014_v47  ;;  %v432_v46 = vunpack.c.l.bf16 %v2249_v21  ;;  %v1027_v47 = vld [vmem:[%s3267_s1 + $0x320] sm:$0xff]  ;;  %v2284_v53 = vld [vmem:[%s2103_s19 + $0x308] sm:$0xff]  ;;  %v514_v61 = vadd.f32 %v513_v34, %v366_v2  ;;  %v464_v2 = vunpack.c.l.bf16 %v2270_v40 }
  0x47   : > { %1381 = vmatpush.msrb.mxu2 %v1029_v55  ;;  %1400 = vmatpush.msrb.mxu3 %v1046_v56  ;;  %v384_v55 = vunpack.c.l.bf16 %v2235_v14  ;;  %v448_v56 = vunpack.c.l.bf16 %v2261_v28  ;;  %v745_v3 = vadd.f32 %v416_v42, %v400_v33  ;;  %v1042_v33 = vld [vmem:[%s3267_s1 + $0x398] sm:$0xff] }
  0x48   : > { %1342 = vmatpush.msrb.mxu0 %v996_v0  ;;  %1361 = vmatpush.msrb.mxu1 %v1013_v1  ;;  %v496_v0 = vunpack.c.l.bf16 %v2273_v41  ;;  %v537_v1 = vadd.f32 %v304_v23, %v288_v22  ;;  %v517_v22 = vadd.f32 %v516_v25, %v514_v61  ;;  %v480_v23 = vunpack.c.l.bf16 %v2284_v53 }
  0x49   : > { %1382 = vmatpush.msrb.mxu2 %v1028_v8  ;;  %1401 = vmatpush.msrb.mxu3 %v1045_v9  ;;  %v1043_v8 = vld [vmem:[%s3267_s1 + $0x3a0] sm:$0xff]  ;;  %v722_v9 = vadd.f32 %v721_v52, %v462_v11  ;;  %v542_v42 = vsel %vm515_vm0, %v384_v55, 0.0  ;;  %v415_v25 = vunpack.c.h.bf16 %v2169_v45  ;;  %v1041_v45 = vld [vmem:[%s3267_s1 + $0x390] sm:$0xff]  ;;  %v351_v61 = vunpack.c.h.bf16 %v2148_v36  ;;  %v1040_v36 = vld [vmem:[%s3267_s1 + $0x388] sm:$0xff] }
  0x4a   : > { %1343 = vmatpush.msrb.mxu0 %v995_v16  ;;  %1362 = vmatpush.msrb.mxu1 %v1012_v24  ;;  %v993_v16 = vld [vmem:[%s3267_s1 + $0x210] sm:$0xff]  ;;  %v538_v11 = vadd.f32 %v537_v1, %v320_v29  ;;  %v746_v24 = vadd.f32 %v745_v3, %v432_v46  ;;  %v992_v29 = vld [vmem:[%s3267_s1 + $0x208] sm:$0xff] }
  0x4b   : > { %1383 = vmatpush.msrb.mxu2 %v1027_v47  ;;  %1402 = vmatpush.msrb.mxu3 %v1044_v51  ;;  %v723_v34 = vadd.f32 %v722_v9, %v478_v17  ;;  %v399_v47 = vunpack.c.h.bf16 %v2166_v44  ;;  %v1009_v46 = vld [vmem:[%s3267_s1 + $0x290] sm:$0xff]  ;;  %v518_v51 = vrot.slane %v517_v22, 4  ;;  %v750_v17 = vsel %vm515_vm0, %v496_v0, 0.0  ;;  %v1024_v44 = vld [vmem:[%s3267_s1 + $0x308] sm:$0xff] }
  0x4c   : > { %1344 = vmatpush.msrb.mxu0 %v994_v59  ;;  %1363 = vmatpush.msrb.mxu1 %v1011_v60  ;;  %v539_v52 = vadd.f32 %v538_v11, %v336_v54  ;;  %v747_v59 = vadd.f32 %v746_v24, %v448_v56  ;;  %v335_v60 = vunpack.c.h.bf16 %v2145_v35  ;;  %v431_v54 = vunpack.c.h.bf16 %v2178_v48  ;;  %v991_v56 = vld [vmem:[%s3267_s1 + $0x200] sm:$0xff]  ;;  %v1008_v0 = vld [vmem:[%s3267_s1 + $0x288] sm:$0xff] }
  0x4d   : > { %1384 = vmatpush.msrb.mxu2 %v1026_v4  ;;  %1403 = vmatpush.msrb.mxu3 %v1043_v8  ;;  %v725_v55 = vadd.f32 %v724_v38, %v723_v34  ;;  %v519_v1 = vadd.f32 %v518_v51, %v517_v22  ;;  %v383_v38 = vunpack.c.h.bf16 %v2163_v43  ;;  %v1023_v35 = vld [vmem:[%s3267_s1 + $0x300] sm:$0xff]  ;;  %v447_v8 = vunpack.c.h.bf16 %v2181_v49 }
  0x4e   : > { %1345 = vmatpush.msrb.mxu0 %v993_v16  ;;  %1364 = vmatpush.msrb.mxu1 %v1010_v18  ;;  %v540_v3 = vadd.f32 %v539_v52, %v352_v10  ;;  %v748_v4 = vadd.f32 %v747_v59, %v464_v2  ;;  %v524_v9 = vadd.f32 %v303_v7, %v287_v63  ;;  %v1007_v18 = vld [vmem:[%s3267_s1 + $0x280] sm:$0xff]  ;;  %v463_v22 = vunpack.c.h.bf16 %v2184_v50 }
  0x4f   : > { %1385 = vmatpush.msrb.mxu2 %v1025_v26  ;;  %1404 = vmatpush.msrb.mxu3 %v1042_v33  ;;  %v726_v48 = vrot.slane %v725_v55, 4  ;;  %v732_v10 = vadd.f32 %v415_v25, %v399_v47  ;;  %v520_v43 = vrot.slane %v519_v1, 2  ;;  %v367_v50 = vunpack.c.h.bf16 %v2151_v37 }
  0x50   : > { %1346 = vmatpush.msrb.mxu0 %v992_v29  ;;  %1365 = vmatpush.msrb.mxu1 %v1009_v46  ;;  %v541_v2 = vadd.f32 %v540_v3, %v368_v12  ;;  %v749_v16 = vadd.f32 %v748_v4, %v480_v23  ;;  %v525_v63 = vadd.f32 %v524_v9, %v319_v15  ;;  %v479_v26 = vunpack.c.h.bf16 %v2196_v57 }
  0x51   : > { %1386 = vmatpush.msrb.mxu2 %v1024_v44  ;;  %1405 = vmatpush.msrb.mxu3 %v1041_v45  ;;  %v727_v49 = vadd.f32 %v726_v48, %v725_v55  ;;  %v733_v7 = vadd.f32 %v732_v10, %v431_v54  ;;  %v521_v12 = vadd.f32 %v520_v43, %v519_v1  ;;  %v529_v32 = vsel %vm515_vm0, %v383_v38, 0.0  ;;  %v1069_v43 = vld [vmem:[%s3267_s1 + $0x470] sm:$0xff] }
  0x52   : > { %1347 = vmatpush.msrb.mxu0 %v991_v56  ;;  %1366 = vmatpush.msrb.mxu1 %v1008_v0  ;;  %v543_v23 = vadd.f32 %v542_v42, %v541_v2  ;;  %v751_v11 = vadd.f32 %v750_v17, %v749_v16  ;;  %v526_v33 = vadd.f32 %v525_v63, %v335_v60  ;;  %v737_v42 = vsel %vm515_vm0, %v495_v31, 0.0 }
  0x53   : > { %1387 = vmatpush.msrb.mxu2 %v1023_v35  ;;  %1406 = vmatpush.msrb.mxu3 %v1040_v36  ;;  %v728_v24 = vrot.slane %v727_v49, 2  ;;  %v734_v34 = vadd.f32 %v733_v7, %v447_v8  ;;  %v522_v47 = vrot.slane %v521_v12, 1  ;;  %v289_v37 = vunpack.c.h.bf16 %v2205_v62  ;;  %v1070_v62 = vld [vmem:[%s3267_s1 + $0x478] sm:$0xff] }
  0x54   : > { %1367 = vmatpush.msrb.mxu1 %v1007_v18  ;;  %v544_v25 = vrot.slane %v543_v23, 4  ;;  %v752_v58 = vrot.slane %v751_v11, 4  ;;  %v527_v29 = vadd.f32 %v526_v33, %v351_v61  ;;  %v305_v59 = vunpack.c.h.bf16 %v2217_v5  ;;  %v2410_v33 = vld [vmem:[%s2103_s19 + $0x1d8] sm:$0xff] }
  0x55   : > { %1407 = vmatpush.msrb.mxu3 %v1039_v30  ;;  %v729_v15 = vadd.f32 %v728_v24, %v727_v49  ;;  %v735_v46 = vadd.f32 %v734_v34, %v463_v22  ;;  %v523_v57 = vadd.f32 %v522_v47, %v521_v12  ;;  %v321_v54 = vunpack.c.h.bf16 %v2220_v6  ;;  %v1102_v30 = vld [vmem:[%s3267_s1 + $0x578] sm:$0xff] }
  0x56   : > { %v545_v51 = vadd.f32 %v544_v25, %v543_v23  ;;  %v753_v52 = vadd.f32 %v752_v58, %v751_v11  ;;  %v528_v44 = vadd.f32 %v527_v29, %v367_v50  ;;  %v401_v56 = vunpack.c.h.bf16 %v2243_v19  ;;  %v2395_v12 = vld [vmem:[%s2103_s19 + $0x18] sm:$0xff] }
  0x57   : > { %v730_v17 = vrot.slane %v729_v15, 1  ;;  %v736_v45 = vadd.f32 %v735_v46, %v479_v26  ;;  %v417_v3 = vunpack.c.h.bf16 %v2246_v20  ;;  %v337_v5 = vunpack.c.h.bf16 %v2232_v13  ;;  %v2407_v26 = vld [vmem:[%s2103_s19 + $0x98] sm:$0xff] }
  0x58   : > { %v546_v55 = vrot.slane %v545_v51, 2  ;;  %v754_v60 = vrot.slane %v753_v52, 2  ;;  %v530_v0 = vadd.f32 %v529_v32, %v528_v44  ;;  %v353_v35 = vunpack.c.h.bf16 %v2258_v27  ;;  %v2420_v32 = vld [vmem:[%s2103_s19 + $0x218] sm:$0xff]  ;;  %v1100_v44 = vld [vmem:[%s3267_s1 + $0x568] sm:$0xff] }
  0x59   : > { %v731_v61 = vadd.f32 %v730_v17, %v729_v15  ;;  %v738_v1 = vadd.f32 %v737_v42, %v736_v45  ;;  %v433_v19 = vunpack.c.h.bf16 %v2249_v21  ;;  %v385_v20 = vunpack.c.h.bf16 %v2235_v14  ;;  %v1068_v14 = vld [vmem:[%s3267_s1 + $0x468] sm:$0xff]  ;;  %v2424_v46 = vld [vmem:[%s2103_s19 + $0x198] sm:$0x11] }
  0x5a   : > { %v547_v4 = vadd.f32 %v546_v55, %v545_v51  ;;  %v755_v38 = vadd.f32 %v754_v60, %v753_v52  ;;  %v531_v6 = vrot.slane %v530_v0, 4  ;;  %v550_v10 = vadd.f32 %v305_v59, %v289_v37  ;;  %v2427_v42 = vld [vmem:[%s2103_s19 + $0x258] sm:$0xff] }
  0x5b   : > { %v1220_v36 = vsel %vm1219_vm1, %v731_v61, %v523_v57  ;;  %v739_v48 = vrot.slane %v738_v1, 4  ;;  %v449_v2 = vunpack.c.h.bf16 %v2261_v28  ;;  %v758_v16 = vadd.f32 %v417_v3, %v401_v56  ;;  %v1066_v37 = vld [vmem:[%s3267_s1 + $0x458] sm:$0xff] }
  0x5c   : > { %1268 = vmatmul.f32.vlgmr.msra.gmra.mxu0 %v1220_v36  ;;  %v548_v8 = vrot.slane %v547_v4, 1  ;;  %v756_v9 = vrot.slane %v755_v38, 1  ;;  %v532_v13 = vadd.f32 %v531_v6, %v530_v0  ;;  %v497_v22 = vunpack.c.h.bf16 %v2273_v41  ;;  %v2398_v41 = vld [vmem:[%s2103_s19 + $0x58] sm:$0xff] }
  0x5d   : > { %1412 = vmatpush.msra.mxu0 %v1070_v62  ;;  %v740_v27 = vadd.f32 %v739_v48, %v738_v1  ;;  %v551_v49 = vadd.f32 %v550_v10, %v321_v54  ;;  %v465_v28 = vunpack.c.h.bf16 %v2270_v40  ;;  %v759_v7 = vadd.f32 %v758_v16, %v433_v19  ;;  %v1067_v40 = vld [vmem:[%s3267_s1 + $0x460] sm:$0xff]  ;;  %v2438_v45 = vld [vmem:[%s2103_s19 + $0x358] sm:$0x11] }
  0x5e   : > { %v549_v18 = vadd.f32 %v548_v8, %v547_v4  ;;  %v757_v21 = vadd.f32 %v756_v9, %v755_v38  ;;  %v533_v31 = vrot.slane %v532_v13, 2  ;;  %v369_v11 = vunpack.c.h.bf16 %v2267_v39  ;;  %v1101_v39 = vld [vmem:[%s3267_s1 + $0x570] sm:$0xff]  ;;  %v2442_v54 = vld [vmem:[%s2103_s19 + $0x298] sm:$0xff]  ;;  %v1099_v38 = vld [vmem:[%s3267_s1 + $0x560] sm:$0xff] }
  0x5f   : > { %v741_v63 = vrot.slane %v740_v27, 2  ;;  %1413 = vmatpush.msra.mxu0 %v1069_v43  ;;  %v481_v50 = vunpack.c.h.bf16 %v2284_v53  ;;  %v552_v24 = vadd.f32 %v551_v49, %v337_v5  ;;  %v555_v25 = vsel %vm515_vm0, %v385_v20, 0.0  ;;  %v2417_v53 = vld [vmem:[%s2103_s19 + $0xd8] sm:$0xff] }
  0x60   : > { %v1222_v23 = vsel %vm1219_vm1, %v757_v21, %v549_v18  ;;  %v534_v34 = vadd.f32 %v533_v31, %v532_v13  ;;  %v760_v58 = vadd.f32 %v759_v7, %v449_v2  ;;  %v763_v29 = vsel %vm515_vm0, %v497_v22, 0.0  ;;  %v2451_v62 = vld [vmem:[%s2103_s19 + $0x118] sm:$0xff]  ;;  %v1085_v18 = vld [vmem:[%s3267_s1 + $0x4f0] sm:$0xff] }
  0x61   : > { %1308 = vmatmul.f32.vlgmr.msra.gmra.mxu2 %v1222_v23  ;;  %v742_v47 = vadd.f32 %v741_v63, %v740_v27  ;;  %1414 = vmatpush.msra.mxu0 %v1068_v14  ;;  %v553_v15 = vadd.f32 %v552_v24, %v353_v35  ;;  %v292_v51 = vunpack.c.l.bf16 %v2395_v12  ;;  %v308_v52 = vunpack.c.l.bf16 %v2398_v41  ;;  %v2454_v5 = vld [vmem:[%s2103_s19 + $0x158] sm:$0xff]  ;;  %v2479_v14 = vld [vmem:[%s2103_s19 + $0x10] sm:$0xff]  ;;  %v1084_v24 = vld [vmem:[%s3267_s1 + $0x4e8] sm:$0xff] }
  0x62   : > { %1452 = vmatpush.msra.mxu2 %v1102_v30  ;;  %v535_v59 = vrot.slane %v534_v34, 1  ;;  %v761_v17 = vadd.f32 %v760_v58, %v465_v28  ;;  %v404_v55 = vunpack.c.l.bf16 %v2410_v33  ;;  %v324_v56 = vunpack.c.l.bf16 %v2407_v26  ;;  %v1086_v6 = vld [vmem:[%s3267_s1 + $0x4f8] sm:$0xff]  ;;  %v2482_v30 = vld [vmem:[%s2103_s19 + $0x50] sm:$0xff] }
  0x63   : > { %v743_v57 = vrot.slane %v742_v47, 1  ;;  %1415 = vmatpush.msra.mxu0 %v1067_v40  ;;  %v554_v60 = vadd.f32 %v553_v15, %v369_v11  ;;  %v340_v61 = vunpack.c.l.bf16 %v2417_v53  ;;  %v420_v0 = vunpack.c.l.bf16 %v2420_v32  ;;  %v2461_v48 = vld [vmem:[%s2103_s19 + $0x2d8] sm:$0xff]  ;;  %v2487_v23 = vld [vmem:[%s2103_s19 + $0x1d0] sm:$0xff] }
  0x64   : > { %1453 = vmatpush.msra.mxu2 %v1101_v39  ;;  %v536_v1 = vadd.f32 %v535_v59, %v534_v34  ;;  %v762_v4 = vadd.f32 %v761_v17, %v481_v50  ;;  %v436_v35 = vunpack.c.l.bf16 %v2427_v42  ;;  %v2464_v19 = vld [vmem:[%s2103_s19 + $0x318] sm:$0xff]  ;;  %v388_v8 = vunpack.c.l.bf16 %v2424_v46  ;;  %v2490_v11 = vld [vmem:[%s2103_s19 + $0x210] sm:$0xff]  ;;  %v1083_v17 = vld [vmem:[%s3267_s1 + $0x4e0] sm:$0xff] }
  0x65   : > { %v744_v3 = vadd.f32 %v743_v57, %v742_v47  ;;  %1416 = vmatpush.msra.mxu0 %v1066_v37  ;;  %v556_v36 = vadd.f32 %v555_v25, %v554_v60  ;;  %v500_v9 = vunpack.c.l.bf16 %v2438_v45  ;;  %v589_v20 = vadd.f32 %v308_v52, %v292_v51  ;;  %v1098_v2 = vld [vmem:[%s3267_s1 + $0x558] sm:$0xff]  ;;  %v2498_v25 = vld [vmem:[%s2103_s19 + $0x90] sm:$0xff] }
  0x66   : > { %1454 = vmatpush.msra.mxu2 %v1100_v44  ;;  %v764_v43 = vadd.f32 %v763_v29, %v762_v4  ;;  %v452_v13 = vunpack.c.l.bf16 %v2442_v54  ;;  %v797_v27 = vadd.f32 %v420_v0, %v404_v55  ;;  %v356_v21 = vunpack.c.l.bf16 %v2451_v62  ;;  %v2501_v58 = vld [vmem:[%s2103_s19 + $0xd0] sm:$0xff] }
  0x67   : > { %v1221_v10 = vsel %vm1219_vm1, %v744_v3, %v536_v1  ;;  %v557_v16 = vrot.slane %v556_v36, 4  ;;  %v372_v22 = vunpack.c.l.bf16 %v2454_v5  ;;  %v590_v49 = vadd.f32 %v589_v20, %v324_v56  ;;  %v2504_v29 = vld [vmem:[%s2103_s19 + $0x110] sm:$0xff] }
  0x68   : > { %1288 = vmatmul.f32.vlgmr.msra.gmra.mxu1 %v1221_v10  ;;  %1455 = vmatpush.msra.mxu2 %v1099_v38  ;;  %v765_v31 = vrot.slane %v764_v43, 4  ;;  %v468_v63 = vunpack.c.l.bf16 %v2461_v48  ;;  %v484_v28 = vunpack.c.l.bf16 %v2464_v19  ;;  %v798_v7 = vadd.f32 %v797_v27, %v436_v35  ;;  %v2507_v51 = vld [vmem:[%s2103_s19 + $0x250] sm:$0xff] }
  0x69   : > { %1432 = vmatpush.msra.mxu1 %v1086_v6  ;;  %v558_v50 = vadd.f32 %v557_v16, %v556_v36  ;;  %v591_v40 = vadd.f32 %v590_v49, %v340_v61  ;;  %v594_v34 = vsel %vm515_vm0, %v388_v8, 0.0  ;;  %v802_v47 = vsel %vm515_vm0, %v500_v9, 0.0  ;;  %v2515_v44 = vld [vmem:[%s2103_s19 + $0x190] sm:$0x11] }
  0x6a   : > { %1456 = vmatpush.msra.mxu2 %v1098_v2  ;;  %v766_v39 = vadd.f32 %v765_v31, %v764_v43  ;;  %v799_v15 = vadd.f32 %v798_v7, %v452_v13  ;;  %v290_v52 = vunpack.c.l.bf16 %v2479_v14  ;;  %v306_v37 = vunpack.c.l.bf16 %v2482_v30  ;;  %v2520_v0 = vld [vmem:[%s2103_s19 + $0x290] sm:$0xff] }
  0x6b   : > { %1433 = vmatpush.msra.mxu1 %v1085_v18  ;;  %v559_v59 = vrot.slane %v558_v50, 2  ;;  %v592_v57 = vadd.f32 %v591_v40, %v356_v21  ;;  %v402_v55 = vunpack.c.l.bf16 %v2487_v23  ;;  %v418_v60 = vunpack.c.l.bf16 %v2490_v11  ;;  %v2525_v35 = vld [vmem:[%s2103_s19 + $0x350] sm:$0x11] }
  0x6c   : > { %v767_v56 = vrot.slane %v766_v39, 2  ;;  %v800_v61 = vadd.f32 %v799_v15, %v468_v63  ;;  %v322_v1 = vunpack.c.l.bf16 %v2498_v25  ;;  %v338_v3 = vunpack.c.l.bf16 %v2501_v58  ;;  %v2530_v20 = vld [vmem:[%s2103_s19 + $0x2d0] sm:$0xff] }
  0x6d   : > { %1434 = vmatpush.msra.mxu1 %v1084_v24  ;;  %v560_v4 = vadd.f32 %v559_v59, %v558_v50  ;;  %v593_v38 = vadd.f32 %v592_v57, %v372_v22  ;;  %v354_v36 = vunpack.c.l.bf16 %v2504_v29  ;;  %v434_v6 = vunpack.c.l.bf16 %v2507_v51  ;;  %v2534_v2 = vld [vmem:[%s2103_s19 + $0x150] sm:$0xff]  ;;  %v1118_v59 = vld [vmem:[%s3267_s1 + $0x5f8] sm:$0xff] }
  0x6e   : > { %v768_v8 = vadd.f32 %v767_v56, %v766_v39  ;;  %v801_v9 = vadd.f32 %v800_v61, %v484_v28  ;;  %v386_v10 = vunpack.c.l.bf16 %v2515_v44  ;;  %v563_v43 = vadd.f32 %v306_v37, %v290_v52  ;;  %v2538_v49 = vld [vmem:[%s2103_s19 + $0x310] sm:$0xff] }
  0x6f   : > { %1435 = vmatpush.msra.mxu1 %v1083_v17  ;;  %v561_v13 = vrot.slane %v560_v4, 1  ;;  %v595_v27 = vadd.f32 %v594_v34, %v593_v38  ;;  %v450_v16 = vunpack.c.l.bf16 %v2520_v0  ;;  %v771_v18 = vadd.f32 %v418_v60, %v402_v55  ;;  %v1065_v52 = vld [vmem:[%s3267_s1 + $0x450] sm:$0xff] }
  0x70   : > { %v769_v21 = vrot.slane %v768_v8, 1  ;;  %v803_v22 = vadd.f32 %v802_v47, %v801_v9  ;;  %v498_v31 = vunpack.c.l.bf16 %v2525_v35  ;;  %v564_v63 = vadd.f32 %v563_v43, %v322_v1  ;;  %v1082_v47 = vld [vmem:[%s3267_s1 + $0x4d8] sm:$0xff]  ;;  %v1097_v37 = vld [vmem:[%s3267_s1 + $0x550] sm:$0xff]  ;;  %1417 = vmatpush.msra.mxu0 %v1065_v52 }
  0x71   : > { %v562_v28 = vadd.f32 %v561_v13, %v560_v4  ;;  %v596_v7 = vrot.slane %v595_v27, 4  ;;  %v466_v50 = vunpack.c.l.bf16 %v2530_v20  ;;  %v772_v24 = vadd.f32 %v771_v18, %v434_v6  ;;  %1436 = vmatpush.msra.mxu1 %v1082_v47  ;;  %1457 = vmatpush.msra.mxu2 %v1097_v37  ;;  %v1117_v4 = vld [vmem:[%s3267_s1 + $0x5f0] sm:$0xff] }
  0x72   : > { %v770_v40 = vadd.f32 %v769_v21, %v768_v8  ;;  %v804_v39 = vrot.slane %v803_v22, 4  ;;  %v370_v34 = vunpack.c.l.bf16 %v2534_v2  ;;  %v565_v15 = vadd.f32 %v564_v63, %v338_v3 }
  0x73   : > { %v597_v57 = vadd.f32 %v596_v7, %v595_v27  ;;  %v482_v17 = vunpack.c.l.bf16 %v2538_v49  ;;  %v568_v55 = vsel %vm515_vm0, %v386_v10, 0.0  ;;  %v773_v60 = vadd.f32 %v772_v24, %v450_v16  ;;  %v1116_v27 = vld [vmem:[%s3267_s1 + $0x5e8] sm:$0xff] }
  0x74   : > { %v1223_v56 = vsel %vm1219_vm1, %v770_v40, %v562_v28  ;;  %v805_v61 = vadd.f32 %v804_v39, %v803_v22  ;;  %v566_v1 = vadd.f32 %v565_v15, %v354_v36  ;;  %v776_v3 = vsel %vm515_vm0, %v498_v31, 0.0  ;;  %v1114_v15 = vld [vmem:[%s3267_s1 + $0x5d8] sm:$0xff] }
  0x75   : > { %1328 = vmatmul.f32.vlgmr.msra.gmra.mxu3 %v1223_v56  ;;  %v598_v38 = vrot.slane %v597_v57, 2  ;;  %v774_v6 = vadd.f32 %v773_v60, %v466_v50  ;;  %v293_v8 = vunpack.c.h.bf16 %v2395_v12  ;;  %v309_v9 = vunpack.c.h.bf16 %v2398_v41  ;;  %v1096_v60 = vld [vmem:[%s3267_s1 + $0x548] sm:$0xff] }
  0x76   : > { %1472 = vmatpush.msra.mxu3 %v1118_v59  ;;  %v806_v10 = vrot.slane %v805_v61, 2  ;;  %v567_v43 = vadd.f32 %v566_v1, %v370_v34  ;;  %v405_v13 = vunpack.c.h.bf16 %v2410_v33  ;;  %v421_v36 = vunpack.c.h.bf16 %v2420_v32  ;;  %v1115_v32 = vld [vmem:[%s3267_s1 + $0x5e0] sm:$0xff]  ;;  %1458 = vmatpush.msra.mxu2 %v1096_v60 }
  0x77   : > { %v599_v16 = vadd.f32 %v598_v38, %v597_v57  ;;  %v775_v18 = vadd.f32 %v774_v6, %v482_v17  ;;  %v325_v21 = vunpack.c.h.bf16 %v2407_v26  ;;  %v341_v22 = vunpack.c.h.bf16 %v2417_v53  ;;  %v1063_v1 = vld [vmem:[%s3267_s1 + $0x440] sm:$0xff] }
  0x78   : > { %1473 = vmatpush.msra.mxu3 %v1117_v4  ;;  %v807_v12 = vadd.f32 %v806_v10, %v805_v61  ;;  %v569_v41 = vadd.f32 %v568_v55, %v567_v43  ;;  %v357_v31 = vunpack.c.h.bf16 %v2451_v62  ;;  %v437_v63 = vunpack.c.h.bf16 %v2427_v42  ;;  %v1081_v55 = vld [vmem:[%s3267_s1 + $0x4d0] sm:$0xff]  ;;  %v1112_v10 = vld [vmem:[%s3267_s1 + $0x5c8] sm:$0xff] }
  0x79   : > { %v600_v33 = vrot.slane %v599_v16, 1  ;;  %v777_v28 = vadd.f32 %v776_v3, %v775_v18  ;;  %v389_v7 = vunpack.c.h.bf16 %v2424_v46  ;;  %v602_v50 = vadd.f32 %v309_v9, %v293_v8  ;;  %v1080_v3 = vld [vmem:[%s3267_s1 + $0x4c8] sm:$0xff]  ;;  %1437 = vmatpush.msra.mxu1 %v1081_v55  ;;  %v1095_v9 = vld [vmem:[%s3267_s1 + $0x540] sm:$0xff] }
  0x7a   : > { %1474 = vmatpush.msra.mxu3 %v1116_v27  ;;  %v808_v26 = vrot.slane %v807_v12, 1  ;;  %v570_v24 = vrot.slane %v569_v41, 4  ;;  %v453_v53 = vunpack.c.h.bf16 %v2442_v54  ;;  %v810_v40 = vadd.f32 %v421_v36, %v405_v13  ;;  %1459 = vmatpush.msra.mxu2 %v1095_v9  ;;  %v2677_v55 = vld [vmem:[%s2103_s19 + $0xa0] sm:$0xff] }
  0x7b   : > { %v601_v39 = vadd.f32 %v600_v33, %v599_v16  ;;  %v778_v34 = vrot.slane %v777_v28, 4  ;;  %v501_v62 = vunpack.c.h.bf16 %v2438_v45  ;;  %v603_v42 = vadd.f32 %v602_v50, %v325_v21  ;;  %v1064_v45 = vld [vmem:[%s3267_s1 + $0x448] sm:$0xff]  ;;  %v1079_v16 = vld [vmem:[%s3267_s1 + $0x4c0] sm:$0xff]  ;;  %1438 = vmatpush.msra.mxu1 %v1080_v3  ;;  %v1093_v50 = vld [vmem:[%s3267_s1 + $0x530] sm:$0xff] }
  0x7c   : > { %v809_v52 = vadd.f32 %v808_v26, %v807_v12  ;;  %1475 = vmatpush.msra.mxu3 %v1115_v32  ;;  %v571_v47 = vadd.f32 %v570_v24, %v569_v41  ;;  %v469_v46 = vunpack.c.h.bf16 %v2461_v48  ;;  %v811_v37 = vadd.f32 %v810_v40, %v437_v63  ;;  %1418 = vmatpush.msra.mxu0 %v1064_v45  ;;  %v1110_v26 = vld [vmem:[%s3267_s1 + $0x5b8] sm:$0xff]  ;;  %v1059_v45 = vld [vmem:[%s3267_s1 + $0x420] sm:$0xff] }
  0x7d   : > { %v779_v59 = vadd.f32 %v778_v34, %v777_v28  ;;  %v373_v57 = vunpack.c.h.bf16 %v2454_v5  ;;  %v485_v54 = vunpack.c.h.bf16 %v2464_v19  ;;  %v604_v17 = vadd.f32 %v603_v42, %v341_v22  ;;  %v1113_v19 = vld [vmem:[%s3267_s1 + $0x5d0] sm:$0xff]  ;;  %1439 = vmatpush.msra.mxu1 %v1079_v16  ;;  %v2653_v34 = vld [vmem:[%s2103_s19 + $0x20] sm:$0xff] }
  0x7e   : > { %v1226_v48 = vsel %vm1219_vm1, %v809_v52, %v601_v39  ;;  %v572_v56 = vrot.slane %v571_v47, 2  ;;  %v607_v5 = vsel %vm515_vm0, %v389_v7, 0.0  ;;  %v812_v61 = vadd.f32 %v811_v37, %v453_v53  ;;  %1476 = vmatpush.msra.mxu3 %v1114_v15  ;;  %1419 = vmatpush.msra.mxu0 %v1063_v1  ;;  %v2666_v37 = vld [vmem:[%s2103_s19 + $0x220] sm:$0xff] }
  0x7f   : > { %1388 = vmatmul.f32.vlgmr.msrb.gmra.mxu2 %v1226_v48  ;;  %v780_v4 = vrot.slane %v779_v59, 2  ;;  %v605_v38 = vadd.f32 %v604_v17, %v357_v31  ;;  %v815_v6 = vsel %vm515_vm0, %v501_v62, 0.0  ;;  %v291_v8 = vunpack.c.h.bf16 %v2479_v14  ;;  %v1062_v14 = vld [vmem:[%s3267_s1 + $0x438] sm:$0xff]  ;;  %v2656_v62 = vld [vmem:[%s2103_s19 + $0x60] sm:$0xff] }
  0x80   : > { %v573_v43 = vadd.f32 %v572_v56, %v571_v47  ;;  %v813_v13 = vadd.f32 %v812_v61, %v469_v46  ;;  %v307_v36 = vunpack.c.h.bf16 %v2482_v30  ;;  %v323_v27 = vunpack.c.h.bf16 %v2498_v25  ;;  %1477 = vmatpush.msra.mxu3 %v1113_v19  ;;  %v1094_v30 = vld [vmem:[%s3267_s1 + $0x538] sm:$0xff]  ;;  %v1111_v25 = vld [vmem:[%s3267_s1 + $0x5c0] sm:$0xff]  ;;  %1420 = vmatpush.msra.mxu0 %v1062_v14  ;;  %v1092_v47 = vld [vmem:[%s3267_s1 + $0x528] sm:$0xff] }
  0x81   : > { %v781_v18 = vadd.f32 %v780_v4, %v779_v59  ;;  %v606_v21 = vadd.f32 %v605_v38, %v373_v57  ;;  %v403_v22 = vunpack.c.h.bf16 %v2487_v23  ;;  %v419_v12 = vunpack.c.h.bf16 %v2490_v11  ;;  %v1061_v23 = vld [vmem:[%s3267_s1 + $0x430] sm:$0xff]  ;;  %v1078_v11 = vld [vmem:[%s3267_s1 + $0x4b8] sm:$0xff]  ;;  %1460 = vmatpush.msra.mxu2 %v1094_v30  ;;  %v2663_v46 = vld [vmem:[%s2103_s19 + $0x1e0] sm:$0xff] }
  0x82   : > { %v574_v41 = vrot.slane %v573_v43, 1  ;;  %v814_v31 = vadd.f32 %v813_v13, %v485_v54  ;;  %v339_v63 = vunpack.c.h.bf16 %v2501_v58  ;;  %v355_v33 = vunpack.c.h.bf16 %v2504_v29  ;;  %1478 = vmatpush.msra.mxu3 %v1112_v10  ;;  %1421 = vmatpush.msra.mxu0 %v1061_v23  ;;  %v1076_v56 = vld [vmem:[%s3267_s1 + $0x4a8] sm:$0xff]  ;;  %v2688_v61 = vld [vmem:[%s2103_s19 + $0x260] sm:$0xff]  ;;  %v1058_v38 = vld [vmem:[%s3267_s1 + $0x418] sm:$0xff] }
  0x83   : > { %v782_v32 = vrot.slane %v781_v18, 1  ;;  %v608_v28 = vadd.f32 %v607_v5, %v606_v21  ;;  %v387_v7 = vunpack.c.h.bf16 %v2515_v44  ;;  %v435_v58 = vunpack.c.h.bf16 %v2507_v51  ;;  %v1060_v51 = vld [vmem:[%s3267_s1 + $0x428] sm:$0xff]  ;;  %v1077_v44 = vld [vmem:[%s3267_s1 + $0x4b0] sm:$0xff]  ;;  %1440 = vmatpush.msra.mxu1 %v1078_v11  ;;  %1461 = vmatpush.msra.mxu2 %v1093_v50  ;;  %v1091_v5 = vld [vmem:[%s3267_s1 + $0x520] sm:$0xff] }
  0x84   : > { %v575_v24 = vadd.f32 %v574_v41, %v573_v43  ;;  %v816_v53 = vadd.f32 %v815_v6, %v814_v31  ;;  %v499_v40 = vunpack.c.h.bf16 %v2525_v35  ;;  %v576_v39 = vadd.f32 %v307_v36, %v291_v8  ;;  %1479 = vmatpush.msra.mxu3 %v1111_v25  ;;  %1422 = vmatpush.msra.mxu0 %v1060_v51  ;;  %v1108_v4 = vld [vmem:[%s3267_s1 + $0x5a8] sm:$0xff]  ;;  %v2699_v6 = vld [vmem:[%s2103_s19 + $0xe0] sm:$0xff]  ;;  %v1090_v43 = vld [vmem:[%s3267_s1 + $0x518] sm:$0xff] }
  0x85   : > { %v783_v42 = vadd.f32 %v782_v32, %v781_v18  ;;  %v609_v15 = vrot.slane %v608_v28, 4  ;;  %v451_v35 = vunpack.c.h.bf16 %v2520_v0  ;;  %v784_v52 = vadd.f32 %v419_v12, %v403_v22  ;;  %v1109_v0 = vld [vmem:[%s3267_s1 + $0x5b0] sm:$0xff]  ;;  %1441 = vmatpush.msra.mxu1 %v1077_v44  ;;  %1462 = vmatpush.msra.mxu2 %v1092_v47  ;;  %v1075_v10 = vld [vmem:[%s3267_s1 + $0x4a0] sm:$0xff]  ;;  %v1074_v41 = vld [vmem:[%s3267_s1 + $0x498] sm:$0xff] }
  0x86   : > { %v817_v59 = vrot.slane %v816_v53, 4  ;;  %v371_v57 = vunpack.c.h.bf16 %v2534_v2  ;;  %v467_v54 = vunpack.c.h.bf16 %v2530_v20  ;;  %v577_v17 = vadd.f32 %v576_v39, %v323_v27  ;;  %1480 = vmatpush.msra.mxu3 %v1110_v26  ;;  %1423 = vmatpush.msra.mxu0 %v1059_v45  ;;  %v2708_v13 = vld [vmem:[%s2103_s19 + $0x120] sm:$0xff]  ;;  %v1057_v21 = vld [vmem:[%s3267_s1 + $0x410] sm:$0xff]  ;;  %v1088_v39 = vld [vmem:[%s3267_s1 + $0x508] sm:$0xff] }
  0x87   : > { %v1224_v60 = vsel %vm1219_vm1, %v783_v42, %v575_v24  ;;  %v610_v48 = vadd.f32 %v609_v15, %v608_v28  ;;  %v483_v2 = vunpack.c.h.bf16 %v2538_v49  ;;  %v785_v20 = vadd.f32 %v784_v52, %v435_v58  ;;  %1442 = vmatpush.msra.mxu1 %v1076_v56  ;;  %1463 = vmatpush.msra.mxu2 %v1091_v5  ;;  %v1107_v18 = vld [vmem:[%s3267_s1 + $0x5a0] sm:$0xff]  ;;  %v1089_v31 = vld [vmem:[%s3267_s1 + $0x510] sm:$0xff]  ;;  %v1106_v28 = vld [vmem:[%s3267_s1 + $0x598] sm:$0xff] }
  0x88   : > { %1348 = vmatmul.f32.vlgmr.msrb.gmra.mxu0 %v1224_v60  ;;  %v818_v19 = vadd.f32 %v817_v59, %v816_v53  ;;  %v578_v1 = vadd.f32 %v577_v17, %v339_v63  ;;  %v581_v3 = vsel %vm515_vm0, %v387_v7, 0.0  ;;  %v789_v49 = vsel %vm515_vm0, %v499_v40, 0.0  ;;  %1481 = vmatpush.msra.mxu3 %v1109_v0  ;;  %v2721_v22 = vld [vmem:[%s2103_s19 + $0x2a0] sm:$0xff]  ;;  %v1056_v7 = vld [vmem:[%s3267_s1 + $0x408] sm:$0xff]  ;;  %v1073_v40 = vld [vmem:[%s3267_s1 + $0x490] sm:$0xff] }
  0x89   : > { %v611_v8 = vrot.slane %v610_v48, 2  ;;  %v786_v9 = vadd.f32 %v785_v20, %v451_v35  ;;  %v294_v36 = vunpack.c.l.bf16 %v2653_v34  ;;  %v310_v27 = vunpack.c.l.bf16 %v2656_v62  ;;  %1424 = vmatpush.msra.mxu0 %v1058_v38  ;;  %v2732_v63 = vld [vmem:[%s2103_s19 + $0x1a0] sm:$0x11]  ;;  %1443 = vmatpush.msra.mxu1 %v1075_v10  ;;  %v1105_v52 = vld [vmem:[%s3267_s1 + $0x590] sm:$0xff]  ;;  %v1072_v45 = vld [vmem:[%s3267_s1 + $0x488] sm:$0xff] }
  0x8a   : > { %v819_v14 = vrot.slane %v818_v19, 2  ;;  %v579_v16 = vadd.f32 %v578_v1, %v355_v33  ;;  %v406_v12 = vunpack.c.l.bf16 %v2663_v46  ;;  %v422_v30 = vunpack.c.l.bf16 %v2666_v37  ;;  %1482 = vmatpush.msra.mxu3 %v1108_v4  ;;  %1464 = vmatpush.msra.mxu2 %v1090_v43  ;;  %v2743_v58 = vld [vmem:[%s2103_s19 + $0x360] sm:$0x11]  ;;  %v1104_v38 = vld [vmem:[%s3267_s1 + $0x588] sm:$0xff]  ;;  %v1134_v10 = vld [vmem:[%s3267_s1 + $0x678] sm:$0xff] }
  0x8b   : > { %v612_v25 = vadd.f32 %v611_v8, %v610_v48  ;;  %v787_v29 = vadd.f32 %v786_v9, %v467_v54  ;;  %v326_v33 = vunpack.c.l.bf16 %v2677_v55  ;;  %v342_v23 = vunpack.c.l.bf16 %v2699_v6  ;;  %1425 = vmatpush.msra.mxu0 %v1057_v21  ;;  %v2754_v51 = vld [vmem:[%s2103_s19 + $0x2e0] sm:$0xff]  ;;  %1444 = vmatpush.msra.mxu1 %v1074_v41  ;;  %v1166_v43 = vld [vmem:[%s3267_s1 + $0x778] sm:$0xff]  ;;  %v2800_v21 = vld [vmem:[%s2103_s19 + $0x228] sm:$0xff] }
  0x8c   : > { %v820_v11 = vadd.f32 %v819_v14, %v818_v19  ;;  %v580_v32 = vadd.f32 %v579_v16, %v371_v57  ;;  %v358_v50 = vunpack.c.l.bf16 %v2708_v13  ;;  %v438_v26 = vunpack.c.l.bf16 %v2688_v61  ;;  %1483 = vmatpush.msra.mxu3 %v1107_v18  ;;  %1465 = vmatpush.msra.mxu2 %v1089_v31  ;;  %v1055_v47 = vld [vmem:[%s3267_s1 + $0x400] sm:$0xff]  ;;  %v2797_v18 = vld [vmem:[%s2103_s19 + $0x1e8] sm:$0xff] }
  0x8d   : > { %v613_v24 = vrot.slane %v612_v25, 1  ;;  %v788_v53 = vadd.f32 %v787_v29, %v483_v2  ;;  %v454_v44 = vunpack.c.l.bf16 %v2721_v22  ;;  %v615_v42 = vadd.f32 %v310_v27, %v294_v36  ;;  %v2764_v59 = vld [vmem:[%s2103_s19 + $0x160] sm:$0xff]  ;;  %1426 = vmatpush.msra.mxu0 %v1056_v7  ;;  %1445 = vmatpush.msra.mxu1 %v1073_v40  ;;  %v2808_v31 = vld [vmem:[%s2103_s19 + $0xa8] sm:$0xff] }
  0x8e   : > { %v821_v15 = vrot.slane %v820_v11, 1  ;;  %v582_v35 = vadd.f32 %v581_v3, %v580_v32  ;;  %v390_v57 = vunpack.c.l.bf16 %v2732_v63  ;;  %v823_v54 = vadd.f32 %v422_v30, %v406_v12  ;;  %1484 = vmatpush.msra.mxu3 %v1106_v28  ;;  %v1087_v60 = vld [vmem:[%s3267_s1 + $0x500] sm:$0xff]  ;;  %1466 = vmatpush.msra.mxu2 %v1088_v39  ;;  %v2779_v3 = vld [vmem:[%s2103_s19 + $0x28] sm:$0xff] }
  0x8f   : > { %v614_v17 = vadd.f32 %v613_v24, %v612_v25  ;;  %v790_v0 = vadd.f32 %v789_v49, %v788_v53  ;;  %v2774_v48 = vld [vmem:[%s2103_s19 + $0x320] sm:$0xff]  ;;  %v502_v2 = vunpack.c.l.bf16 %v2743_v58  ;;  %v616_v20 = vadd.f32 %v615_v42, %v326_v33  ;;  %v2782_v49 = vld [vmem:[%s2103_s19 + $0x68] sm:$0xff]  ;;  %1427 = vmatpush.msra.mxu0 %v1055_v47  ;;  %1446 = vmatpush.msra.mxu1 %v1072_v45 }
  0x90   : > { %v822_v56 = vadd.f32 %v821_v15, %v820_v11  ;;  %v583_v5 = vrot.slane %v582_v35, 4  ;;  %v470_v19 = vunpack.c.l.bf16 %v2754_v51  ;;  %v824_v1 = vadd.f32 %v823_v54, %v438_v26  ;;  %1485 = vmatpush.msra.mxu3 %v1105_v52  ;;  %1467 = vmatpush.msra.mxu2 %v1087_v60  ;;  %v1071_v12 = vld [vmem:[%s3267_s1 + $0x480] sm:$0xff]  ;;  %v2811_v33 = vld [vmem:[%s2103_s19 + $0xe8] sm:$0xff] }
  0x91   : > { %v791_v4 = vrot.slane %v790_v0, 4  ;;  %v374_v8 = vunpack.c.l.bf16 %v2764_v59  ;;  %v617_v9 = vadd.f32 %v616_v20, %v342_v23  ;;  %v486_v14 = vunpack.c.l.bf16 %v2774_v48  ;;  %1492 = vmatpush.msrb.mxu0 %v1134_v10  ;;  %v1103_v23 = vld [vmem:[%s3267_s1 + $0x580] sm:$0xff]  ;;  %v2817_v28 = vld [vmem:[%s2103_s19 + $0x128] sm:$0xff]  ;;  %1447 = vmatpush.msra.mxu1 %v1071_v12 }
  0x92   : > { %v1227_v36 = vsel %vm1219_vm1, %v822_v56, %v614_v17  ;;  %v584_v27 = vadd.f32 %v583_v5, %v582_v35  ;;  %v825_v16 = vadd.f32 %v824_v1, %v454_v44  ;;  %v620_v29 = vsel %vm515_vm0, %v390_v57, 0.0  ;;  %1486 = vmatpush.msra.mxu3 %v1104_v38  ;;  %v2820_v7 = vld [vmem:[%s2103_s19 + $0x268] sm:$0xff]  ;;  %1532 = vmatpush.msrb.mxu2 %v1166_v43 }
  0x93   : > { %1408 = vmatmul.f32.vlgmr.msrb.gmra.mxu3 %v1227_v36  ;;  %v792_v30 = vadd.f32 %v791_v4, %v790_v0  ;;  %v618_v25 = vadd.f32 %v617_v9, %v358_v50  ;;  %v828_v41 = vsel %vm515_vm0, %v502_v2, 0.0  ;;  %v296_v50 = vunpack.c.l.bf16 %v2779_v3  ;;  %v2825_v40 = vld [vmem:[%s2103_s19 + $0x1a8] sm:$0x11] }
  0x94   : > { %v585_v11 = vrot.slane %v584_v27, 2  ;;  %v826_v32 = vadd.f32 %v825_v16, %v470_v19  ;;  %v312_v26 = vunpack.c.l.bf16 %v2782_v49  ;;  %v408_v39 = vunpack.c.l.bf16 %v2797_v18  ;;  %v2830_v35 = vld [vmem:[%s2103_s19 + $0x2a8] sm:$0xff]  ;;  %1487 = vmatpush.msra.mxu3 %v1103_v23 }
  0x95   : > { %v793_v24 = vrot.slane %v792_v30, 2  ;;  %v619_v53 = vadd.f32 %v618_v25, %v374_v8  ;;  %v424_v44 = vunpack.c.l.bf16 %v2800_v21  ;;  %v328_v52 = vunpack.c.l.bf16 %v2808_v31  ;;  %v2835_v17 = vld [vmem:[%s2103_s19 + $0x168] sm:$0xff] }
  0x96   : > { %v586_v42 = vadd.f32 %v585_v11, %v584_v27  ;;  %v827_v15 = vadd.f32 %v826_v32, %v486_v14  ;;  %v344_v47 = vunpack.c.l.bf16 %v2811_v33  ;;  %v360_v0 = vunpack.c.l.bf16 %v2817_v28  ;;  %v2840_v20 = vld [vmem:[%s2103_s19 + $0x2e8] sm:$0xff] }
  0x97   : > { %v794_v57 = vadd.f32 %v793_v24, %v792_v30  ;;  %v621_v54 = vadd.f32 %v620_v29, %v619_v53  ;;  %v440_v45 = vunpack.c.l.bf16 %v2820_v7  ;;  %v392_v56 = vunpack.c.l.bf16 %v2825_v40  ;;  %v2844_v4 = vld [vmem:[%s2103_s19 + $0x328] sm:$0xff] }
  0x98   : > { %v587_v60 = vrot.slane %v586_v42, 1  ;;  %v829_v2 = vadd.f32 %v828_v41, %v827_v15  ;;  %v641_v5 = vadd.f32 %v312_v26, %v296_v50  ;;  %v2847_v38 = vld [vmem:[%s2103_s19 + $0x368] sm:$0x11]  ;;  %v456_v8 = vunpack.c.l.bf16 %v2830_v35 }
  0x99   : > { %v795_v19 = vrot.slane %v794_v57, 1  ;;  %v622_v1 = vrot.slane %v621_v54, 4  ;;  %v849_v9 = vadd.f32 %v424_v44, %v408_v39  ;;  %v376_v36 = vunpack.c.l.bf16 %v2835_v17 }
  0x9a   : > { %v588_v10 = vadd.f32 %v587_v60, %v586_v42  ;;  %v830_v43 = vrot.slane %v829_v2, 4  ;;  %v642_v27 = vadd.f32 %v641_v5, %v328_v52  ;;  %v472_v12 = vunpack.c.l.bf16 %v2840_v20 }
  0x9b   : > { %v796_v14 = vadd.f32 %v795_v19, %v794_v57  ;;  %v623_v16 = vadd.f32 %v622_v1, %v621_v54  ;;  %v850_v30 = vadd.f32 %v849_v9, %v440_v45  ;;  %v488_v29 = vunpack.c.l.bf16 %v2844_v4 }
  0x9c   : > { %v831_v25 = vadd.f32 %v830_v43, %v829_v2  ;;  %v504_v41 = vunpack.c.l.bf16 %v2847_v38  ;;  %v643_v23 = vadd.f32 %v642_v27, %v344_v47  ;;  %v646_v50 = vsel %vm515_vm0, %v392_v56, 0.0 }
  0x9d   : > { %v1225_v11 = vsel %vm1219_vm1, %v796_v14, %v588_v10  ;;  %v624_v32 = vrot.slane %v623_v16, 2  ;;  %v851_v26 = vadd.f32 %v850_v30, %v456_v8  ;;  %v295_v39 = vunpack.c.h.bf16 %v2653_v34 }
  0x9e   : > { %1368 = vmatmul.f32.vlgmr.msrb.gmra.mxu1 %v1225_v11  ;;  %v832_v24 = vrot.slane %v831_v25, 2  ;;  %v644_v53 = vadd.f32 %v643_v23, %v360_v0  ;;  %v311_v44 = vunpack.c.h.bf16 %v2656_v62  ;;  %v407_v52 = vunpack.c.h.bf16 %v2663_v46 }
  0x9f   : > { %v625_v42 = vadd.f32 %v624_v32, %v623_v16  ;;  %v852_v15 = vadd.f32 %v851_v26, %v472_v12  ;;  %v423_v57 = vunpack.c.h.bf16 %v2666_v37  ;;  %v854_v45 = vsel %vm515_vm0, %v504_v41, 0.0  ;;  %v1165_v16 = vld [vmem:[%s3267_s1 + $0x770] sm:$0xff]  ;;  %v1164_v32 = vld [vmem:[%s3267_s1 + $0x768] sm:$0xff]  ;;  %v1131_v26 = vld [vmem:[%s3267_s1 + $0x660] sm:$0xff] }
  0xa0   : > { %v833_v47 = vadd.f32 %v832_v24, %v831_v25  ;;  %v645_v54 = vadd.f32 %v644_v53, %v376_v36  ;;  %v327_v60 = vunpack.c.h.bf16 %v2677_v55  ;;  %v343_v0 = vunpack.c.h.bf16 %v2699_v6  ;;  %v1132_v25 = vld [vmem:[%s3267_s1 + $0x668] sm:$0xff]  ;;  %1533 = vmatpush.msrb.mxu2 %v1165_v16 }
  0xa1   : > { %v626_v2 = vrot.slane %v625_v42, 1  ;;  %v853_v56 = vadd.f32 %v852_v15, %v488_v29  ;;  %v439_v34 = vunpack.c.h.bf16 %v2688_v61  ;;  %v391_v19 = vunpack.c.h.bf16 %v2732_v63  ;;  %v1133_v63 = vld [vmem:[%s3267_s1 + $0x670] sm:$0xff] }
  0xa2   : > { %v834_v5 = vrot.slane %v833_v47, 1  ;;  %v647_v62 = vadd.f32 %v646_v50, %v645_v54  ;;  %v628_v1 = vadd.f32 %v311_v44, %v295_v39  ;;  %v455_v37 = vunpack.c.h.bf16 %v2721_v22  ;;  %v1150_v22 = vld [vmem:[%s3267_s1 + $0x6f8] sm:$0xff]  ;;  %1493 = vmatpush.msrb.mxu0 %v1133_v63  ;;  %v1149_v29 = vld [vmem:[%s3267_s1 + $0x6f0] sm:$0xff]  ;;  %v1148_v44 = vld [vmem:[%s3267_s1 + $0x6e8] sm:$0xff]  ;;  %1534 = vmatpush.msrb.mxu2 %v1164_v32 }
  0xa3   : > { %v627_v46 = vadd.f32 %v626_v2, %v625_v42  ;;  %v855_v8 = vadd.f32 %v854_v45, %v853_v56  ;;  %v836_v9 = vadd.f32 %v423_v57, %v407_v52  ;;  %v359_v55 = vunpack.c.h.bf16 %v2708_v13  ;;  %1512 = vmatpush.msrb.mxu1 %v1150_v22  ;;  %v1181_v50 = vld [vmem:[%s3267_s1 + $0x7f0] sm:$0xff]  ;;  %v1163_v42 = vld [vmem:[%s3267_s1 + $0x760] sm:$0xff] }
  0xa4   : > { %v835_v10 = vadd.f32 %v834_v5, %v833_v47  ;;  %v648_v43 = vrot.slane %v647_v62, 4  ;;  %v629_v36 = vadd.f32 %v628_v1, %v327_v60  ;;  %v375_v6 = vunpack.c.h.bf16 %v2764_v59  ;;  %1494 = vmatpush.msrb.mxu0 %v1132_v25  ;;  %1535 = vmatpush.msrb.mxu2 %v1163_v42  ;;  %v1127_v25 = vld [vmem:[%s3267_s1 + $0x640] sm:$0xff] }
  0xa5   : > { %v856_v27 = vrot.slane %v855_v8, 4  ;;  %v471_v61 = vunpack.c.h.bf16 %v2754_v51  ;;  %v837_v14 = vadd.f32 %v836_v9, %v439_v34  ;;  %v503_v59 = vunpack.c.h.bf16 %v2743_v58  ;;  %v1182_v51 = vld [vmem:[%s3267_s1 + $0x7f8] sm:$0xff]  ;;  %1513 = vmatpush.msrb.mxu1 %v1149_v29 }
  0xa6   : > { %v1228_v13 = vsel %vm1219_vm1, %v835_v10, %v627_v46  ;;  %v649_v12 = vadd.f32 %v648_v43, %v647_v62  ;;  %v630_v30 = vadd.f32 %v629_v36, %v343_v0  ;;  %v487_v23 = vunpack.c.h.bf16 %v2774_v48  ;;  %1552 = vmatpush.msrb.mxu3 %v1182_v51  ;;  %1495 = vmatpush.msrb.mxu0 %v1131_v26  ;;  %v1129_v62 = vld [vmem:[%s3267_s1 + $0x650] sm:$0xff] }
  0xa7   : > { %1428 = vmatmul.f32.vlgmr.msra.gmra.mxu0 %v1228_v13  ;;  %v857_v41 = vadd.f32 %v856_v27, %v855_v8  ;;  %v633_v58 = vsel %vm515_vm0, %v391_v19, 0.0  ;;  %v838_v11 = vadd.f32 %v837_v14, %v455_v37  ;;  %v297_v48 = vunpack.c.h.bf16 %v2779_v3  ;;  %v1180_v3 = vld [vmem:[%s3267_s1 + $0x7e8] sm:$0xff]  ;;  %1514 = vmatpush.msrb.mxu1 %v1148_v44 }
  0xa8   : > { %v650_v24 = vrot.slane %v649_v12, 2  ;;  %v631_v53 = vadd.f32 %v630_v30, %v359_v55  ;;  %v313_v39 = vunpack.c.h.bf16 %v2782_v49  ;;  %v409_v57 = vunpack.c.h.bf16 %v2797_v18  ;;  %v1130_v49 = vld [vmem:[%s3267_s1 + $0x658] sm:$0xff]  ;;  %1553 = vmatpush.msrb.mxu3 %v1181_v50  ;;  %v1147_v18 = vld [vmem:[%s3267_s1 + $0x6e0] sm:$0xff]  ;;  %v1128_v55 = vld [vmem:[%s3267_s1 + $0x648] sm:$0xff] }
  0xa9   : > { %v858_v15 = vrot.slane %v857_v41, 2  ;;  %v839_v52 = vadd.f32 %v838_v11, %v471_v61  ;;  %v425_v47 = vunpack.c.h.bf16 %v2800_v21  ;;  %v841_v60 = vsel %vm515_vm0, %v503_v59, 0.0  ;;  %v1162_v21 = vld [vmem:[%s3267_s1 + $0x758] sm:$0xff]  ;;  %1496 = vmatpush.msrb.mxu0 %v1130_v49  ;;  %1515 = vmatpush.msrb.mxu1 %v1147_v18  ;;  %v1160_v14 = vld [vmem:[%s3267_s1 + $0x748] sm:$0xff]  ;;  %v1157_v49 = vld [vmem:[%s3267_s1 + $0x730] sm:$0xff] }
  0xaa   : > { %v651_v54 = vadd.f32 %v650_v24, %v649_v12  ;;  %v632_v45 = vadd.f32 %v631_v53, %v375_v6  ;;  %v329_v2 = vunpack.c.h.bf16 %v2808_v31  ;;  %v345_v34 = vunpack.c.h.bf16 %v2811_v33  ;;  %v1179_v31 = vld [vmem:[%s3267_s1 + $0x7e0] sm:$0xff]  ;;  %1554 = vmatpush.msrb.mxu3 %v1180_v3  ;;  %v1146_v33 = vld [vmem:[%s3267_s1 + $0x6d8] sm:$0xff]  ;;  %1536 = vmatpush.msrb.mxu2 %v1162_v21  ;;  %v1141_v18 = vld [vmem:[%s3267_s1 + $0x6b0] sm:$0xff] }
  0xab   : > { %v859_v56 = vadd.f32 %v858_v15, %v857_v41  ;;  %v840_v0 = vadd.f32 %v839_v52, %v487_v23  ;;  %v441_v5 = vunpack.c.h.bf16 %v2820_v7  ;;  %v361_v46 = vunpack.c.h.bf16 %v2817_v28  ;;  %v1161_v7 = vld [vmem:[%s3267_s1 + $0x750] sm:$0xff]  ;;  %v1178_v28 = vld [vmem:[%s3267_s1 + $0x7d8] sm:$0xff]  ;;  %1497 = vmatpush.msrb.mxu0 %v1129_v62  ;;  %1516 = vmatpush.msrb.mxu1 %v1146_v33  ;;  %v1156_v21 = vld [vmem:[%s3267_s1 + $0x728] sm:$0xff] }
  0xac   : > { %v652_v19 = vrot.slane %v651_v54, 1  ;;  %v634_v1 = vadd.f32 %v633_v58, %v632_v45  ;;  %v654_v8 = vadd.f32 %v313_v39, %v297_v48  ;;  %v457_v10 = vunpack.c.h.bf16 %v2830_v35  ;;  %1555 = vmatpush.msrb.mxu3 %v1179_v31  ;;  %v1145_v35 = vld [vmem:[%s3267_s1 + $0x6d0] sm:$0xff]  ;;  %1537 = vmatpush.msrb.mxu2 %v1161_v7  ;;  %v1126_v50 = vld [vmem:[%s3267_s1 + $0x638] sm:$0xff]  ;;  %v1175_v39 = vld [vmem:[%s3267_s1 + $0x7c0] sm:$0xff] }
  0xad   : > { %v860_v37 = vrot.slane %v859_v56, 1  ;;  %v842_v9 = vadd.f32 %v841_v60, %v840_v0  ;;  %v862_v43 = vadd.f32 %v425_v47, %v409_v57  ;;  %v393_v6 = vunpack.c.h.bf16 %v2825_v40  ;;  %v1177_v40 = vld [vmem:[%s3267_s1 + $0x7d0] sm:$0xff]  ;;  %1498 = vmatpush.msrb.mxu0 %v1128_v55  ;;  %1517 = vmatpush.msrb.mxu1 %v1145_v35  ;;  %v1158_v48 = vld [vmem:[%s3267_s1 + $0x738] sm:$0xff]  ;;  %v1140_v31 = vld [vmem:[%s3267_s1 + $0x6a8] sm:$0xff] }
  0xae   : > { %v653_v36 = vadd.f32 %v652_v19, %v651_v54  ;;  %v635_v27 = vrot.slane %v634_v1, 4  ;;  %v655_v61 = vadd.f32 %v654_v8, %v329_v2  ;;  %v473_v16 = vunpack.c.h.bf16 %v2840_v20  ;;  %1556 = vmatpush.msrb.mxu3 %v1178_v28  ;;  %v1144_v20 = vld [vmem:[%s3267_s1 + $0x6c8] sm:$0xff]  ;;  %1538 = vmatpush.msrb.mxu2 %v1160_v14  ;;  %v1125_v52 = vld [vmem:[%s3267_s1 + $0x630] sm:$0xff]  ;;  %v1142_v57 = vld [vmem:[%s3267_s1 + $0x6b8] sm:$0xff] }
  0xaf   : > { %v861_v63 = vadd.f32 %v860_v37, %v859_v56  ;;  %v843_v22 = vrot.slane %v842_v9, 4  ;;  %v863_v13 = vadd.f32 %v862_v43, %v441_v5  ;;  %v377_v59 = vunpack.c.h.bf16 %v2835_v17  ;;  %v1159_v17 = vld [vmem:[%s3267_s1 + $0x740] sm:$0xff]  ;;  %1499 = vmatpush.msrb.mxu0 %v1127_v25  ;;  %1518 = vmatpush.msrb.mxu1 %v1144_v20  ;;  %v1174_v54 = vld [vmem:[%s3267_s1 + $0x7b8] sm:$0xff]  ;;  %v1124_v2 = vld [vmem:[%s3267_s1 + $0x628] sm:$0xff] }
  0xb0   : > { %v636_v12 = vadd.f32 %v635_v27, %v634_v1  ;;  %v505_v30 = vunpack.c.h.bf16 %v2847_v38  ;;  %v656_v51 = vadd.f32 %v655_v61, %v345_v34  ;;  %v489_v23 = vunpack.c.h.bf16 %v2844_v4  ;;  %v1176_v38 = vld [vmem:[%s3267_s1 + $0x7c8] sm:$0xff]  ;;  %1557 = vmatpush.msrb.mxu3 %v1177_v40  ;;  %v1143_v4 = vld [vmem:[%s3267_s1 + $0x6c0] sm:$0xff]  ;;  %1539 = vmatpush.msrb.mxu2 %v1159_v17  ;;  %v1173_v34 = vld [vmem:[%s3267_s1 + $0x7b0] sm:$0xff] }
  0xb1   : > { %v1230_v29 = vsel %vm1219_vm1, %v861_v63, %v653_v36  ;;  %v844_v41 = vadd.f32 %v843_v22, %v842_v9  ;;  %v864_v58 = vadd.f32 %v863_v13, %v457_v10  ;;  %v659_v24 = vsel %vm515_vm0, %v393_v6, 0.0  ;;  %1500 = vmatpush.msrb.mxu0 %v1126_v50  ;;  %1519 = vmatpush.msrb.mxu1 %v1143_v4  ;;  %v1123_v5 = vld [vmem:[%s3267_s1 + $0x620] sm:$0xff]  ;;  %v1122_v8 = vld [vmem:[%s3267_s1 + $0x618] sm:$0xff]  ;;  %v3033_v10 = vld [vmem:[%s2103_s19 + $0x30] sm:$0xff] }
  0xb2   : > { %1468 = vmatmul.f32.vlgmr.msra.gmra.mxu2 %v1230_v29  ;;  %v637_v11 = vrot.slane %v636_v12, 2  ;;  %v657_v32 = vadd.f32 %v656_v51, %v361_v46  ;;  %v867_v15 = vsel %vm515_vm0, %v505_v30, 0.0  ;;  %1558 = vmatpush.msrb.mxu3 %v1176_v38  ;;  %v1155_v1 = vld [vmem:[%s3267_s1 + $0x720] sm:$0xff]  ;;  %v1172_v46 = vld [vmem:[%s3267_s1 + $0x7a8] sm:$0xff]  ;;  %v1154_v9 = vld [vmem:[%s3267_s1 + $0x718] sm:$0xff]  ;;  %v298_v40 = vunpack.c.l.bf16 %v3033_v10 }
  0xb3   : > { %v845_v26 = vrot.slane %v844_v41, 2  ;;  %v865_v53 = vadd.f32 %v864_v58, %v473_v16  ;;  %1540 = vmatpush.msrb.mxu2 %v1158_v48  ;;  %1501 = vmatpush.msrb.mxu0 %v1125_v52  ;;  %v1139_v37 = vld [vmem:[%s3267_s1 + $0x6a0] sm:$0xff]  ;;  %v3036_v43 = vld [vmem:[%s2103_s19 + $0x70] sm:$0xff]  ;;  %v1138_v14 = vld [vmem:[%s3267_s1 + $0x698] sm:$0xff] }
  0xb4   : > { %v638_v44 = vadd.f32 %v637_v11, %v636_v12  ;;  %v658_v42 = vadd.f32 %v657_v32, %v377_v59  ;;  %1559 = vmatpush.msrb.mxu3 %v1175_v39  ;;  %1520 = vmatpush.msrb.mxu1 %v1142_v57  ;;  %v1171_v55 = vld [vmem:[%s3267_s1 + $0x7a0] sm:$0xff]  ;;  %v1121_v36 = vld [vmem:[%s3267_s1 + $0x610] sm:$0xff]  ;;  %v314_v12 = vunpack.c.l.bf16 %v3036_v43  ;;  %v1170_v30 = vld [vmem:[%s3267_s1 + $0x798] sm:$0xff] }
  0xb5   : > { %v846_v47 = vadd.f32 %v845_v26, %v844_v41  ;;  %v866_v3 = vadd.f32 %v865_v53, %v489_v23  ;;  %1541 = vmatpush.msrb.mxu2 %v1157_v49  ;;  %1502 = vmatpush.msrb.mxu0 %v1124_v2  ;;  %v3045_v27 = vld [vmem:[%s2103_s19 + $0xb0] sm:$0xff]  ;;  %v1120_v51 = vld [vmem:[%s3267_s1 + $0x608] sm:$0xff]  ;;  %v1119_v52 = vld [vmem:[%s3267_s1 + $0x600] sm:$0xff] }
  0xb6   : > { %v639_v45 = vrot.slane %v638_v44, 1  ;;  %v660_v60 = vadd.f32 %v659_v24, %v658_v42  ;;  %1560 = vmatpush.msrb.mxu3 %v1174_v54  ;;  %1521 = vmatpush.msrb.mxu1 %v1141_v18  ;;  %v3048_v6 = vld [vmem:[%s2103_s19 + $0xf0] sm:$0xff]  ;;  %v330_v32 = vunpack.c.l.bf16 %v3045_v27  ;;  %v1152_v24 = vld [vmem:[%s3267_s1 + $0x708] sm:$0xff]  ;;  %v3116_v49 = vld [vmem:[%s2103_s19 + $0x38] sm:$0xff] }
  0xb7   : > { %v847_v56 = vrot.slane %v846_v47, 1  ;;  %v868_v0 = vadd.f32 %v867_v15, %v866_v3  ;;  %1542 = vmatpush.msrb.mxu2 %v1156_v21  ;;  %1503 = vmatpush.msrb.mxu0 %v1123_v5  ;;  %v1153_v63 = vld [vmem:[%s3267_s1 + $0x710] sm:$0xff]  ;;  %v346_v39 = vunpack.c.l.bf16 %v3048_v6  ;;  %v3119_v54 = vld [vmem:[%s2103_s19 + $0x78] sm:$0xff]  ;;  %v1151_v2 = vld [vmem:[%s3267_s1 + $0x700] sm:$0xff] }
  0xb8   : > { %v640_v62 = vadd.f32 %v639_v45, %v638_v44  ;;  %v661_v19 = vrot.slane %v660_v60, 4  ;;  %1561 = vmatpush.msrb.mxu3 %v1173_v34  ;;  %1522 = vmatpush.msrb.mxu1 %v1140_v31  ;;  %v3058_v22 = vld [vmem:[%s2103_s19 + $0x1b0] sm:$0x11] }
  0xb9   : > { %v848_v33 = vadd.f32 %v847_v56, %v846_v47  ;;  %v869_v7 = vrot.slane %v868_v0, 4  ;;  %v3061_v16 = vld [vmem:[%s2103_s19 + $0x1f0] sm:$0xff]  ;;  %1543 = vmatpush.msrb.mxu2 %v1155_v1  ;;  %1504 = vmatpush.msrb.mxu0 %v1122_v8  ;;  %v394_v44 = vunpack.c.l.bf16 %v3058_v22  ;;  %v667_v47 = vadd.f32 %v314_v12, %v298_v40  ;;  %v3138_v1 = vld [vmem:[%s2103_s19 + $0x1f8] sm:$0xff]  ;;  %v1135_v12 = vld [vmem:[%s3267_s1 + $0x680] sm:$0xff] }
  0xba   : > { %v662_v28 = vadd.f32 %v661_v19, %v660_v60  ;;  %v3064_v13 = vld [vmem:[%s2103_s19 + $0x230] sm:$0xff]  ;;  %v410_v41 = vunpack.c.l.bf16 %v3061_v16  ;;  %1562 = vmatpush.msrb.mxu3 %v1172_v46  ;;  %1523 = vmatpush.msrb.mxu1 %v1139_v37  ;;  %v1136_v60 = vld [vmem:[%s3267_s1 + $0x688] sm:$0xff]  ;;  %v3135_v19 = vld [vmem:[%s2103_s19 + $0x1b8] sm:$0x11] }
  0xbb   : > { %v1229_v61 = vsel %vm1219_vm1, %v848_v33, %v640_v62  ;;  %v870_v35 = vadd.f32 %v869_v7, %v868_v0  ;;  %v3075_v25 = vld [vmem:[%s2103_s19 + $0x130] sm:$0xff]  ;;  %v426_v50 = vunpack.c.l.bf16 %v3064_v13  ;;  %1544 = vmatpush.msrb.mxu2 %v1154_v9  ;;  %1505 = vmatpush.msrb.mxu0 %v1121_v36  ;;  %v3131_v0 = vld [vmem:[%s2103_s19 + $0xb8] sm:$0xff]  ;;  %v668_v31 = vadd.f32 %v667_v47, %v330_v32  ;;  %v1168_v33 = vld [vmem:[%s3267_s1 + $0x788] sm:$0xff] }
  0xbc   : > { %1448 = vmatmul.f32.vlgmr.msra.gmra.mxu1 %v1229_v61  ;;  %v663_v59 = vrot.slane %v662_v28, 2  ;;  %v3078_v20 = vld [vmem:[%s2103_s19 + $0x270] sm:$0xff]  ;;  %1563 = vmatpush.msrb.mxu3 %v1171_v55  ;;  %v362_v18 = vunpack.c.l.bf16 %v3075_v25  ;;  %v3141_v46 = vld [vmem:[%s2103_s19 + $0x238] sm:$0xff]  ;;  %v672_v7 = vsel %vm515_vm0, %v394_v44, 0.0  ;;  %v316_v55 = vunpack.c.l.bf16 %v3119_v54 }
  0xbd   : > { %v3081_v29 = vld [vmem:[%s2103_s19 + $0x2b0] sm:$0xff]  ;;  %v871_v23 = vrot.slane %v870_v35, 2  ;;  %v442_v4 = vunpack.c.l.bf16 %v3078_v20  ;;  %v875_v3 = vadd.f32 %v426_v50, %v410_v41  ;;  %1524 = vmatpush.msrb.mxu1 %v1138_v14  ;;  %1545 = vmatpush.msrb.mxu2 %v1153_v63  ;;  %v3148_v37 = vld [vmem:[%s2103_s19 + $0xf8] sm:$0xff]  ;;  %v669_v61 = vadd.f32 %v668_v31, %v346_v39 }
  0xbe   : > { %v1137_v58 = vld [vmem:[%s3267_s1 + $0x690] sm:$0xff]  ;;  %v664_v26 = vadd.f32 %v663_v59, %v662_v28  ;;  %v458_v42 = vunpack.c.l.bf16 %v3081_v29  ;;  %1564 = vmatpush.msrb.mxu3 %v1170_v30  ;;  %1506 = vmatpush.msrb.mxu0 %v1120_v51  ;;  %v3151_v9 = vld [vmem:[%s2103_s19 + $0x278] sm:$0xff]  ;;  %v300_v28 = vunpack.c.l.bf16 %v3116_v49  ;;  %v332_v30 = vunpack.c.l.bf16 %v3131_v0 }
  0xbf   : > { %v3088_v17 = vld [vmem:[%s2103_s19 + $0x170] sm:$0xff]  ;;  %v872_v15 = vadd.f32 %v871_v23, %v870_v35  ;;  %v876_v62 = vadd.f32 %v875_v3, %v442_v4  ;;  %1525 = vmatpush.msrb.mxu1 %v1137_v58  ;;  %1546 = vmatpush.msrb.mxu2 %v1152_v24  ;;  %v3157_v63 = vld [vmem:[%s2103_s19 + $0x138] sm:$0xff]  ;;  %v396_v51 = vunpack.c.l.bf16 %v3135_v19  ;;  %v412_v41 = vunpack.c.l.bf16 %v3138_v1  ;;  %v1167_v58 = vld [vmem:[%s3267_s1 + $0x780] sm:$0xff] }
  0xc0   : > { %v3091_v38 = vld [vmem:[%s2103_s19 + $0x2f0] sm:$0xff]  ;;  %v665_v45 = vrot.slane %v664_v26, 1  ;;  %v378_v21 = vunpack.c.l.bf16 %v3088_v17  ;;  %1507 = vmatpush.msrb.mxu0 %v1119_v52  ;;  %v3160_v40 = vld [vmem:[%s2103_s19 + $0x378] sm:$0x11]  ;;  %v428_v23 = vunpack.c.l.bf16 %v3141_v46  ;;  %v670_v50 = vadd.f32 %v669_v61, %v362_v18 }
  0xc1   : > { %v3094_v11 = vld [vmem:[%s2103_s19 + $0x370] sm:$0x11]  ;;  %v474_v56 = vunpack.c.l.bf16 %v3091_v38  ;;  %v873_v34 = vrot.slane %v872_v15, 1  ;;  %v877_v35 = vadd.f32 %v876_v62, %v458_v42  ;;  %1526 = vmatpush.msrb.mxu1 %v1136_v60  ;;  %1547 = vmatpush.msrb.mxu2 %v1151_v2  ;;  %v3166_v59 = vld [vmem:[%s2103_s19 + $0x2b8] sm:$0xff]  ;;  %v444_v39 = vunpack.c.l.bf16 %v3151_v9 }
  0xc2   : > { %v1169_v53 = vld [vmem:[%s3267_s1 + $0x790] sm:$0xff]  ;;  %v506_v57 = vunpack.c.l.bf16 %v3094_v11  ;;  %v666_v8 = vadd.f32 %v665_v45, %v664_v26  ;;  %v3177_v26 = vld [vmem:[%s2103_s19 + $0x178] sm:$0xff]  ;;  %v348_v44 = vunpack.c.l.bf16 %v3148_v37  ;;  %v364_v42 = vunpack.c.l.bf16 %v3157_v63 }
  0xc3   : > { %v3106_v48 = vld [vmem:[%s2103_s19 + $0x330] sm:$0xff]  ;;  %v874_v36 = vadd.f32 %v873_v34, %v872_v15  ;;  %1565 = vmatpush.msrb.mxu3 %v1169_v53  ;;  %v878_v4 = vadd.f32 %v877_v35, %v474_v56  ;;  %v3180_v24 = vld [vmem:[%s2103_s19 + $0x2f8] sm:$0xff]  ;;  %v508_v15 = vunpack.c.l.bf16 %v3160_v40  ;;  %v693_v52 = vadd.f32 %v316_v55, %v300_v28  ;;  %1527 = vmatpush.msrb.mxu1 %v1135_v12 }
  0xc4   : > { %v490_v5 = vunpack.c.l.bf16 %v3106_v48  ;;  %v880_v14 = vsel %vm515_vm0, %v506_v57, 0.0  ;;  %v3183_v53 = vld [vmem:[%s2103_s19 + $0x338] sm:$0xff]  ;;  %v671_v57 = vadd.f32 %v670_v50, %v378_v21  ;;  %v460_v3 = vunpack.c.l.bf16 %v3166_v59 }
  0xc5   : > { %v1231_v32 = vsel %vm1219_vm1, %v874_v36, %v666_v8  ;;  %1566 = vmatpush.msrb.mxu3 %v1168_v33  ;;  %v901_v45 = vadd.f32 %v428_v23, %v412_v41  ;;  %v380_v60 = vunpack.c.l.bf16 %v3177_v26  ;;  %v476_v2 = vunpack.c.l.bf16 %v3180_v24 }
  0xc6   : > { %1488 = vmatmul.f32.vlgmr.msra.gmra.mxu3 %v1231_v32  ;;  %v879_v47 = vadd.f32 %v878_v4, %v490_v5  ;;  %v492_v18 = vunpack.c.l.bf16 %v3183_v53  ;;  %v694_v56 = vadd.f32 %v693_v52, %v332_v30  ;;  %v673_v34 = vadd.f32 %v672_v7, %v671_v57 }
  0xc7   : > { %1567 = vmatpush.msrb.mxu3 %v1167_v58  ;;  %v698_v62 = vsel %vm515_vm0, %v396_v51, 0.0  ;;  %v902_v8 = vadd.f32 %v901_v45, %v444_v39  ;;  %v906_v21 = vsel %vm515_vm0, %v508_v15, 0.0  ;;  %v299_v5 = vunpack.c.h.bf16 %v3033_v10 }
  0xc8   : > { %v881_v31 = vadd.f32 %v880_v14, %v879_v47  ;;  %v695_v33 = vadd.f32 %v694_v56, %v348_v44  ;;  %v315_v28 = vunpack.c.h.bf16 %v3036_v43  ;;  %v674_v55 = vrot.slane %v673_v34, 4 }
  0xc9   : > { %v903_v61 = vadd.f32 %v902_v8, %v460_v3  ;;  %v331_v35 = vunpack.c.h.bf16 %v3045_v27  ;;  %v347_v30 = vunpack.c.h.bf16 %v3048_v6  ;;  %v411_v7 = vunpack.c.h.bf16 %v3061_v16 }
  0xca   : > { %v882_v36 = vrot.slane %v881_v31, 4  ;;  %v696_v12 = vadd.f32 %v695_v33, %v364_v42  ;;  %v427_v14 = vunpack.c.h.bf16 %v3064_v13  ;;  %v675_v51 = vadd.f32 %v674_v55, %v673_v34 }
  0xcb   : > { %v904_v23 = vadd.f32 %v903_v61, %v476_v2  ;;  %v363_v58 = vunpack.c.h.bf16 %v3075_v25  ;;  %v379_v43 = vunpack.c.h.bf16 %v3088_v17  ;;  %v443_v32 = vunpack.c.h.bf16 %v3078_v20 }
  0xcc   : > { %v883_v41 = vadd.f32 %v882_v36, %v881_v31  ;;  %v697_v10 = vadd.f32 %v696_v12, %v380_v60  ;;  %v680_v50 = vadd.f32 %v315_v28, %v299_v5  ;;  %v676_v4 = vrot.slane %v675_v51, 2 }
  0xcd   : > { %v905_v39 = vadd.f32 %v904_v23, %v492_v18  ;;  %v395_v6 = vunpack.c.h.bf16 %v3058_v22  ;;  %v459_v16 = vunpack.c.h.bf16 %v3081_v29  ;;  %v888_v42 = vadd.f32 %v427_v14, %v411_v7 }
  0xce   : > { %v884_v27 = vrot.slane %v883_v41, 2  ;;  %v699_v44 = vadd.f32 %v698_v62, %v697_v10  ;;  %v681_v13 = vadd.f32 %v680_v50, %v331_v35  ;;  %v677_v15 = vadd.f32 %v676_v4, %v675_v51 }
  0xcf   : > { %v907_v57 = vadd.f32 %v906_v21, %v905_v39  ;;  %v507_v25 = vunpack.c.h.bf16 %v3094_v11  ;;  %v475_v17 = vunpack.c.h.bf16 %v3091_v38  ;;  %v889_v3 = vadd.f32 %v888_v42, %v443_v32 }
  0xd0   : > { %v885_v52 = vadd.f32 %v884_v27, %v883_v41  ;;  %v700_v47 = vrot.slane %v699_v44, 4  ;;  %v682_v20 = vadd.f32 %v681_v13, %v347_v30  ;;  %v678_v45 = vrot.slane %v677_v15, 1 }
  0xd1   : > { %v908_v2 = vrot.slane %v907_v57, 4  ;;  %v491_v22 = vunpack.c.h.bf16 %v3106_v48  ;;  %v685_v29 = vsel %vm515_vm0, %v395_v6, 0.0  ;;  %v890_v34 = vadd.f32 %v889_v3, %v459_v16 }
  0xd2   : > { %v886_v60 = vrot.slane %v885_v52, 1  ;;  %v701_v18 = vadd.f32 %v700_v47, %v699_v44  ;;  %v683_v56 = vadd.f32 %v682_v20, %v363_v58  ;;  %v679_v31 = vadd.f32 %v678_v45, %v677_v15 }
  0xd3   : > { %v909_v8 = vadd.f32 %v908_v2, %v907_v57  ;;  %v893_v11 = vsel %vm515_vm0, %v507_v25, 0.0  ;;  %v891_v38 = vadd.f32 %v890_v34, %v475_v17  ;;  %v301_v5 = vunpack.c.h.bf16 %v3116_v49 }
  0xd4   : > { %v887_v62 = vadd.f32 %v886_v60, %v885_v52  ;;  %v702_v33 = vrot.slane %v701_v18, 2  ;;  %v684_v21 = vadd.f32 %v683_v56, %v379_v43  ;;  %v317_v48 = vunpack.c.h.bf16 %v3119_v54 }
  0xd5   : > { %v910_v55 = vrot.slane %v909_v8, 2  ;;  %v413_v36 = vunpack.c.h.bf16 %v3138_v1  ;;  %v892_v12 = vadd.f32 %v891_v38, %v491_v22  ;;  %v429_v30 = vunpack.c.h.bf16 %v3141_v46 }
  0xd6   : > { %v1232_v28 = vsel %vm1219_vm1, %v887_v62, %v679_v31  ;;  %v703_v61 = vadd.f32 %v702_v33, %v701_v18  ;;  %v686_v35 = vadd.f32 %v685_v29, %v684_v21  ;;  %v333_v14 = vunpack.c.h.bf16 %v3131_v0 }
  0xd7   : > { %1508 = vmatmul.f32.vlgmr.msrb.gmra.mxu0 %v1232_v28  ;;  %v911_v7 = vadd.f32 %v910_v55, %v909_v8  ;;  %v894_v23 = vadd.f32 %v893_v11, %v892_v12  ;;  %v445_v49 = vunpack.c.h.bf16 %v3151_v9  ;;  %v349_v10 = vunpack.c.h.bf16 %v3148_v37  ;;  %v1699_v55 = vld [vmem:[%s3268_s2] ss:$0 sm:$0xff] }
  0xd8   : > { %v704_v51 = vrot.slane %v703_v61, 1  ;;  %v687_v41 = vrot.slane %v686_v35, 4  ;;  %v461_v54 = vunpack.c.h.bf16 %v3166_v59  ;;  %v706_v1 = vadd.f32 %v317_v48, %v301_v5 }
  0xd9   : > { %v912_v58 = vrot.slane %v911_v7, 1  ;;  %v895_v50 = vrot.slane %v894_v23, 4  ;;  %v914_v4 = vadd.f32 %v429_v30, %v413_v36  ;;  %v365_v46 = vunpack.c.h.bf16 %v3157_v63  ;;  %v1269_v48 = vpop.f32.mrf.mxu0 }
  0xda   : > { %v705_v43 = vadd.f32 %v704_v51, %v703_v61  ;;  %v688_v32 = vadd.f32 %v687_v41, %v686_v35  ;;  %v397_v0 = vunpack.c.h.bf16 %v3135_v19  ;;  %v707_v39 = vadd.f32 %v706_v1, %v333_v14 }
  0xdb   : > { %v913_v27 = vadd.f32 %v912_v58, %v911_v7  ;;  %v896_v44 = vadd.f32 %v895_v50, %v894_v23  ;;  %v477_v9 = vunpack.c.h.bf16 %v3180_v24  ;;  %v915_v16 = vadd.f32 %v914_v4, %v445_v49 }
  0xdc   : > { %v689_v6 = vrot.slane %v688_v32, 2  ;;  %v381_v59 = vunpack.c.h.bf16 %v3177_v26  ;;  %v509_v13 = vunpack.c.h.bf16 %v3160_v40  ;;  %v708_v42 = vadd.f32 %v707_v39, %v349_v10 }
  0xdd   : > { %v1234_v37 = vsel %vm1219_vm1, %v913_v27, %v705_v43  ;;  %v897_v52 = vrot.slane %v896_v44, 2  ;;  %v493_v63 = vunpack.c.h.bf16 %v3183_v53  ;;  %v916_v57 = vadd.f32 %v915_v16, %v461_v54 }
  0xde   : > { %1548 = vmatmul.f32.vlgmr.msrb.gmra.mxu2 %v1234_v37  ;;  %v690_v15 = vadd.f32 %v689_v6, %v688_v32  ;;  %v709_v19 = vadd.f32 %v708_v42, %v365_v46  ;;  %v711_v17 = vsel %vm515_vm0, %v397_v0, 0.0  ;;  %v919_v3 = vsel %vm515_vm0, %v509_v13, 0.0 }
  0xdf   : > { %v898_v47 = vadd.f32 %v897_v52, %v896_v44  ;;  %v917_v24 = vadd.f32 %v916_v57, %v477_v9  ;;  %v1270_v36 = vadd.f32 %v1699_v55, %v1269_v48 }
  0xe0   : > { %v691_v25 = vrot.slane %v690_v15, 1  ;;  %v710_v20 = vadd.f32 %v709_v19, %v381_v59 }
  0xe1   : > { %v899_v26 = vrot.slane %v898_v47, 1  ;;  %v918_v60 = vadd.f32 %v917_v24, %v493_v63 }
  0xe2   : > { %v692_v45 = vadd.f32 %v691_v25, %v690_v15  ;;  %v712_v40 = vadd.f32 %v711_v17, %v710_v20 }
  0xe3   : > { %v900_v2 = vadd.f32 %v899_v26, %v898_v47  ;;  %v920_v22 = vadd.f32 %v919_v3, %v918_v60 }
  0xe4   : > { %v713_v18 = vrot.slane %v712_v40, 4  ;;  %v1309_v12 = vpop.f32.mrf.mxu2 }
  0xe5   : > { %v1233_v56 = vsel %vm1219_vm1, %v900_v2, %v692_v45  ;;  %v921_v53 = vrot.slane %v920_v22, 4  ;;  %v1289_v61 = vpop.f32.mrf.mxu1 }
  0xe6   : > { %1528 = vmatmul.f32.vlgmr.msrb.gmra.mxu1 %v1233_v56  ;;  %v714_v29 = vadd.f32 %v713_v18, %v712_v40  ;;  %v1290_v35 = vadd.f32 %v1289_v61, %v1270_v36 }
  0xe7   : > { %v922_v34 = vadd.f32 %v921_v53, %v920_v22 }
  0xe8   : > { %v715_v31 = vrot.slane %v714_v29, 2  ;;  %v1310_v30 = vadd.f32 %v1309_v12, %v1290_v35 }
  0xe9   : > { %v923_v62 = vrot.slane %v922_v34, 2 }
  0xea   : > { %v716_v8 = vadd.f32 %v715_v31, %v714_v29 }
  0xeb   : > { %v924_v11 = vadd.f32 %v923_v62, %v922_v34 }
  0xec   : > { %v717_v33 = vrot.slane %v716_v8, 1 }
  0xed   : > { %v925_v21 = vrot.slane %v924_v11, 1 }
  0xee   : > { %v718_v38 = vadd.f32 %v717_v33, %v716_v8 }
  0xef   : > { %v926_v5 = vadd.f32 %v925_v21, %v924_v11 }
  0xf1   : > { %v1235_v28 = vsel %vm1219_vm1, %v926_v5, %v718_v38 }
  0xf2   : > { %1568 = vmatmul.f32.vlgmr.msrb.gmra.mxu3 %v1235_v28 }
  0xf8   : > { %v1329_v7 = vpop.f32.mrf.mxu3 }
  0xf9   : > { %v1330_v14 = vadd.f32 %v1329_v7, %v1310_v30 }
 0x102   : > { %v1389_v58 = vpop.f32.mrf.mxu2 }
 0x105   : > { %v1349_v51 = vpop.f32.mrf.mxu0 }
 0x106   : > { %v1350_v41 = vadd.f32 %v1349_v51, %v1330_v14 }
 0x116   : > { %v1409_v54 = vpop.f32.mrf.mxu3 }
 0x11b   : > { %v1369_v23 = vpop.f32.mrf.mxu1 }
 0x11c   : > { %v1370_v49 = vadd.f32 %v1369_v23, %v1350_v41 }
 0x11e   : > { %v1390_v10 = vadd.f32 %v1389_v58, %v1370_v49 }
 0x120   : > { %v1410_v43 = vadd.f32 %v1409_v54, %v1390_v10 }
 0x124   : > { %v1429_v1 = vpop.f32.mrf.mxu0 }
 0x125   : > { %v1430_v32 = vadd.f32 %v1429_v1, %v1410_v43 }
 0x135   : > { %v1469_v4 = vpop.f32.mrf.mxu2 }
 0x139   : > { %v1449_v50 = vpop.f32.mrf.mxu1 }
 0x13a   : > { %v1450_v27 = vadd.f32 %v1449_v50, %v1430_v32 }
 0x13c   : > { %v1470_v46 = vadd.f32 %v1469_v4, %v1450_v27 }
 0x149   : > { %v1489_v0 = vpop.f32.mrf.mxu3 }
 0x14a   : > { %v1490_v6 = vadd.f32 %v1489_v0, %v1470_v46 }
 0x154   : > { %v1509_v39 = vpop.f32.mrf.mxu0 }
 0x155   : > { %v1510_v44 = vadd.f32 %v1509_v39, %v1490_v6 }
 0x161   : > { %v1549_v16 = vpop.f32.mrf.mxu2 }
 0x163   : > { %v1529_v9 = vpop.f32.mrf.mxu1 }
 0x164   : > { %v1530_v37 = vadd.f32 %v1529_v9, %v1510_v44 }
 0x166   : > { %v1550_v59 = vadd.f32 %v1549_v16, %v1530_v37 }
 0x175   : > { %v1569_v13 = vpop.f32.mrf.mxu3 }
 0x176   : > { %v1570_v42 = vadd.f32 %v1569_v13, %v1550_v59 }
 0x178   : > { %1572 = vst [vmem:[%s166_s6] sm:$0x3] %v1570_v42 }
 0x179   : > { %1727 = shalt.err (!%p1724_p3)
}
 0x17a   : > { %1660 = dma.vmem_to_hbm [thread:$0]  (%p1821_p5), %s1587_s29, 32, %s1589_s30, %s1574_s4  }
 0x17b PF: > { %p1666_p4 = scmp.ge.s32.totalorder %s1762_s15, 2  ;;  %s1600_s17 = sand.u32 1, %s1750_s12  }
 0x17c   : > { %s1601_s19 = scalar_lea.sflag [#allocation3], %s1600_s17 }
 0x17d   : > { %p1663_p7 = pnand %p1666_p4, %p1825_p6 }
 0x17f   : > { %p1664_p8 = pneg %p1663_p7 }
 0x181   : > { %1745 = dma.done.wait (%p1664_p8), %s1601_s19, 32  }
 0x182   : > { %1747 = vsyncadd (%p1664_p8), %s1601_s19, 4294967264  ;;  %p13_p9 = scmp.ge.s32.totalorder %s1807_s18, 6   ;;  %s3272_s12 = smov %s1754_s13 }
 0x183   : > { %s3273_s13 = smov %s1758_s14  ;;  %s3274_s14 = smov %s1819_s21 }
 0x184   : > { %s3275_s15 = smov %s1807_s18  ;;  %15 = sbr.rel (!%p13_p9) target bundleno = 3 (0x3), region = 67 }
 0x189   :  { %1607 = vsyncpa [#allocation3], 1 }
 0x18a   :  { %1609 = vsyncpa [#allocation3 + $0x1], 1 }

</bundles_post_ra>
